<compile_context>
chip_gen: v5e
topology: v5e:2x2
jax: 0.10.0
libtpu: 0.0.40
codegen_flags: <defaults>
</compile_context>

<pallas_src>
import functools

import jax
import jax.numpy as jnp
from jax.experimental import pallas as pl
from jax.experimental.pallas import tpu as pltpu


# 3x3 taps in row-major (ky, kx) order: t == (dy + 1) * 3 + (dx + 1)
_TAPS = tuple((dy, dx) for dy in (-1, 0, 1) for dx in (-1, 0, 1))


def _sigmoid(v):
    # Exact identity 0.5*(tanh(v/2)+1): tanh goes to the EUP slot, no VALU divide.
    return 0.5 * (jnp.tanh(0.5 * v) + 1.0)


def _silu(v):
    return v * _sigmoid(v)


def _eca_bottleneck_kernel(w1_ref, b1_ref, w2_ref, b2_ref, eca_ref, x_ref,
                           o_ref, a1_scr, a2_scr, pool_scr,
                           *, H, W, C1, CM, C2, NB, add):
    HW = H * W
    x = x_ref[0]                                        # (C1*NB, HW), rows [c*NB + n]

    # Per-input-channel row blocks (NB, HW), sliced once and reused.
    xs = [x[ci * NB:(ci + 1) * NB, :] for ci in range(C1)]

    # ---- cv1: 1x1 conv (BN folded) + SiLU; weights are SMEM scalars --------
    for co in range(CM):
        acc = [None, None]                              # 2 parallel FMA chains
        for ci in range(C1):
            term = w1_ref[co * C1 + ci] * xs[ci]
            k = ci & 1
            acc[k] = term if acc[k] is None else acc[k] + term
        blk = acc[0] if acc[1] is None else acc[0] + acc[1]
        a1_scr[co * NB:(co + 1) * NB, :] = blk + b1_ref[co]
    a1 = _silu(a1_scr[...])                             # full (CM*NB, HW) slab

    # ---- hoisted border masks (built once, ANDed once, reused by all taps) -
    lane = jax.lax.broadcasted_iota(jnp.int32, (CM * NB, HW), 1)
    if (W & (W - 1)) == 0:
        col = jnp.bitwise_and(lane, W - 1)              # lane % W (W power of 2)
    else:
        col = lane % W  # TODO(synk): precompute column index for non-pow2 W
    row_ok = {-1: lane >= W, 0: None, 1: lane < (H - 1) * W}
    col_ok = {-1: col >= 1, 0: None, 1: col < (W - 1)}

    def _combine(r, c):
        if r is None:
            return c
        if c is None:
            return r
        return r & c

    masks = {(dy, dx): _combine(row_ok[dy], col_ok[dx]) for (dy, dx) in _TAPS}

    # ---- cv2: 3x3 conv (padding=1, BN folded) + SiLU ------------------------
    # One full-slab lane roll + one full-slab mask per tap; then scalar x slab
    # FMAs with two parallel chains per output channel group.
    acc2 = [[None, None] for _ in range(C2)]
    for t, (dy, dx) in enumerate(_TAPS):
        shift = dy * W + dx
        src = a1 if shift == 0 else pltpu.roll(a1, (-shift) % HW, axis=1)
        m = masks[(dy, dx)]
        if m is not None:
            src = jnp.where(m, src, 0.0)
        for ci in range(CM):
            rows = src[ci * NB:(ci + 1) * NB, :]        # (NB, HW)
            k = (t * CM + ci) & 1
            for co2 in range(C2):
                term = w2_ref[(co2 * CM + ci) * 9 + t] * rows
                a = acc2[co2]
                a[k] = term if a[k] is None else a[k] + term
    for co2 in range(C2):
        blk = acc2[co2][0]
        if acc2[co2][1] is not None:
            blk = blk + acc2[co2][1]
        a2_scr[co2 * NB:(co2 + 1) * NB, :] = blk + b2_ref[co2]
    a2 = _silu(a2_scr[...])                             # full (C2*NB, HW) slab

    # ---- ECA: one lane reduction -> k=3 channel conv via zero-padded column -
    pooled = jnp.sum(a2, axis=1, keepdims=True) * jnp.float32(1.0 / HW)  # (C2*NB, 1)
    zpad = jnp.zeros((NB, 1), jnp.float32)
    pool_scr[0:NB, :] = zpad
    pool_scr[NB:(C2 + 1) * NB, :] = pooled
    pool_scr[(C2 + 1) * NB:(C2 + 2) * NB, :] = zpad
    prev_c = pool_scr[0:C2 * NB, :]                     # pooled[channel-1] (0 at edge)
    next_c = pool_scr[2 * NB:(C2 + 2) * NB, :]          # pooled[channel+1] (0 at edge)
    z = eca_ref[0] * prev_c + eca_ref[1] * pooled + eca_ref[2] * next_c
    scale = _sigmoid(z)                                 # (C2*NB, 1)

    out = a2 * scale                                    # per-row lane broadcast
    if add:
        out = out + x                                   # residual (c1 == c2)
    o_ref[0] = out.astype(o_ref.dtype)


def _pick_images_per_step(N, C1, CM, C2, HW, budget_bytes=8 << 20):
    """Smallest divisor of N that fills the 8 f32 sublanes, within a VMEM budget."""
    divisors = [d for d in range(1, N + 1) if N % d == 0]
    ok = [d for d in divisors
          if 4 * d * HW * (3 * (C1 + C2) + 2 * CM) <= budget_bytes]
    if not ok:
        return 1
    for d in ok:
        if d * min(C1, C2) >= 8:
            return d
    return ok[-1]


def eca_bottleneck(x, params, *, shortcut=True, eps=1e-5):
    """Fused ECABottleneck forward (inference-mode BatchNorm).

    x:      (N, C1, H, W) float32, NCHW like PyTorch.
    params: PyTorch-layout tensors:
      cv1_w (C_, C1, 1, 1), bn1_{g,b,m,v} (C_,),
      cv2_w (C2, C_, 3, 3), bn2_{g,b,m,v} (C2,),
      eca_w (1, 1, 3)   -- nn.Conv1d(1, 1, 3, padding=1, bias=False).weight
    """
    N, C1, H, W = x.shape
    HW = H * W
    cv1_w = params["cv1_w"]
    cv2_w = params["cv2_w"]
    CM = cv1_w.shape[0]
    C2 = cv2_w.shape[0]
    assert cv2_w.shape[1] == CM, "grouped cv2 not supported (g must be 1)"
    add = bool(shortcut) and (C1 == C2)

    # Fold inference BatchNorm into conv weights / bias.
    s1 = params["bn1_g"] / jnp.sqrt(params["bn1_v"] + eps)            # (CM,)
    b1 = params["bn1_b"] - params["bn1_m"] * s1
    w1_eff = cv1_w.reshape(CM, C1) * s1[:, None]                      # (CM, C1)
    s2 = params["bn2_g"] / jnp.sqrt(params["bn2_v"] + eps)            # (C2,)
    b2 = params["bn2_b"] - params["bn2_m"] * s2
    w2_eff = cv2_w * s2[:, None, None, None]                          # (C2, CM, 3, 3)

    # All tiny parameters become flat SMEM scalar arrays.
    w1_s = w1_eff.reshape(-1).astype(jnp.float32)       # (CM*C1,)     idx co*C1+ci
    b1_s = b1.astype(jnp.float32)                       # (CM,)
    w2_s = w2_eff.reshape(-1).astype(jnp.float32)       # (C2*CM*9,)   idx (co2*CM+ci)*9+t
    b2_s = b2.astype(jnp.float32)                       # (C2,)
    eca_s = params["eca_w"].reshape(3).astype(jnp.float32)            # (3,)

    NB = _pick_images_per_step(N, C1, CM, C2, HW)
    NG = N // NB

    # Layout plumbing (cheap wrapper-side transpose): channel-major rows
    # [c*NB + n] so every conv weight is a single SMEM scalar in the kernel and
    # all elementwise / roll / mask / ECA work runs on full (C*NB, HW) slabs.
    x_g = (x.reshape(NG, NB, C1, HW)
            .transpose(0, 2, 1, 3)
            .reshape(NG, C1 * NB, HW))

    kernel = functools.partial(_eca_bottleneck_kernel, H=H, W=W, C1=C1, CM=CM,
                               C2=C2, NB=NB, add=add)
    smem = pl.BlockSpec(memory_space=pltpu.MemorySpace.SMEM)

    out_g = pl.pallas_call(
        kernel,
        out_shape=jax.ShapeDtypeStruct((NG, C2 * NB, HW), x.dtype),
        grid=(NG,),
        in_specs=[smem, smem, smem, smem, smem,                       # w1,b1,w2,b2,eca
                  pl.BlockSpec((1, C1 * NB, HW), lambda g: (g, 0, 0))],
        out_specs=pl.BlockSpec((1, C2 * NB, HW), lambda g: (g, 0, 0)),  # lane-dense
        scratch_shapes=[
            pltpu.VMEM((CM * NB, HW), jnp.float32),       # cv1 pre-activation slab
            pltpu.VMEM((C2 * NB, HW), jnp.float32),       # cv2 pre-activation slab
            pltpu.VMEM(((C2 + 2) * NB, 1), jnp.float32),  # zero-padded pooled column
        ],
        compiler_params=pltpu.CompilerParams(
            dimension_semantics=("parallel",),            # megacore / 2x TC on v7x
            vmem_limit_bytes=32 * 1024 * 1024,
        ),
    )(w1_s, b1_s, w2_s, b2_s, eca_s, x_g)

    return (out_g.reshape(NG, C2, NB, HW)
                 .transpose(0, 2, 1, 3)
                 .reshape(N, C2, H, W))


def _reference(x, params, *, shortcut=True, eps=1e-5):
    """Pure-JAX reference mirroring the PyTorch forward (eval-mode BN)."""
    def bn(y, g, b, m, v):
        shp = (1, -1, 1, 1)
        return (g.reshape(shp) * (y - m.reshape(shp)) /
                jnp.sqrt(v.reshape(shp) + eps) + b.reshape(shp))

    def silu(y):
        return y * jax.nn.sigmoid(y)

    dn = ("NCHW", "OIHW", "NCHW")
    y1 = jax.lax.conv_general_dilated(x, params["cv1_w"], (1, 1), "VALID",
                                      dimension_numbers=dn)
    y1 = silu(bn(y1, params["bn1_g"], params["bn1_b"], params["bn1_m"], params["bn1_v"]))
    y2 = jax.lax.conv_general_dilated(y1, params["cv2_w"], (1, 1), ((1, 1), (1, 1)),
                                      dimension_numbers=dn)
    y2 = silu(bn(y2, params["bn2_g"], params["bn2_b"], params["bn2_m"], params["bn2_v"]))

    pooled = jnp.mean(y2, axis=(2, 3))                                # (N, C2)
    k = params["eca_w"].reshape(3)
    pp = jnp.pad(pooled, ((0, 0), (1, 1)))
    z = k[0] * pp[:, :-2] + k[1] * pp[:, 1:-1] + k[2] * pp[:, 2:]
    s = jax.nn.sigmoid(z)[:, :, None, None]
    out = y2 * s
    add = bool(shortcut) and (x.shape[1] == y2.shape[1])
    return x + out if add else out


if __name__ == "__main__":
    key = jax.random.PRNGKey(0)
    ks = jax.random.split(key, 12)

    N, C1, C2, H, W = 2, 4, 4, 16, 16
    e = 0.5
    CM = max(1, int(C2 * e))            # hidden channels c_ = 2

    x = jax.random.normal(ks[0], (N, C1, H, W), dtype=jnp.float32)

    params = {
        "cv1_w": 0.5 * jax.random.normal(ks[1], (CM, C1, 1, 1), jnp.float32),
        "bn1_g": 1.0 + 0.1 * jax.random.normal(ks[2], (CM,), jnp.float32),
        "bn1_b": 0.1 * jax.random.normal(ks[3], (CM,), jnp.float32),
        "bn1_m": 0.1 * jax.random.normal(ks[4], (CM,), jnp.float32),
        "bn1_v": 0.5 + jax.random.uniform(ks[5], (CM,), jnp.float32),
        "cv2_w": 0.25 * jax.random.normal(ks[6], (C2, CM, 3, 3), jnp.float32),
        "bn2_g": 1.0 + 0.1 * jax.random.normal(ks[7], (C2,), jnp.float32),
        "bn2_b": 0.1 * jax.random.normal(ks[8], (C2,), jnp.float32),
        "bn2_m": 0.1 * jax.random.normal(ks[9], (C2,), jnp.float32),
        "bn2_v": 0.5 + jax.random.uniform(ks[10], (C2,), jnp.float32),
        "eca_w": 0.5 * jax.random.normal(ks[11], (1, 1, 3), jnp.float32),
    }

    out = eca_bottleneck(x, params, shortcut=True)
    out = jax.block_until_ready(out)

    ref = _reference(x, params, shortcut=True)
    assert out.shape == (N, C2, H, W)
    err = jnp.max(jnp.abs(out - ref))
    assert jnp.allclose(out, ref, atol=1e-3, rtol=1e-3), f"mismatch, max abs err {err}"

    print("KERNEL_OK")
</pallas_src>

<mosaic_0001>
module attributes {stable_mosaic.version = 11 : i64} {
  func.func @_eca_bottleneck_kernel(%arg0: i32, %arg1: memref<8xf32, #tpu.memory_space<smem>>, %arg2: memref<2xf32, #tpu.memory_space<smem>>, %arg3: memref<72xf32, #tpu.memory_space<smem>>, %arg4: memref<4xf32, #tpu.memory_space<smem>>, %arg5: memref<3xf32, #tpu.memory_space<smem>>, %arg6: memref<1x8x256xf32, #tpu.memory_space<vmem>>, %arg7: memref<1x8x256xf32, #tpu.memory_space<vmem>>, %arg8: memref<4x256xf32, #tpu.memory_space<vmem>>, %arg9: memref<8x256xf32, #tpu.memory_space<vmem>>, %arg10: memref<12x1xf32, #tpu.memory_space<vmem>>) attributes {dimension_semantics = [#tpu.dimension_semantics<parallel>], iteration_bounds = array<i64: 1>, scalar_prefetch = 0 : i64, scratch_operands = 3 : i64, tpu.core_type = #tpu.core_type<tc>, window_params = [{transform_indices = @transform_0, window_bounds = array<i64: 8>}, {transform_indices = @transform_1, window_bounds = array<i64: 2>}, {transform_indices = @transform_2, window_bounds = array<i64: 72>}, {transform_indices = @transform_3, window_bounds = array<i64: 4>}, {transform_indices = @transform_4, window_bounds = array<i64: 3>}, {transform_indices = @transform_5, window_bounds = array<i64: 1, 8, 256>}, {transform_indices = @transform_6, window_bounds = array<i64: 1, 8, 256>}]} {
    %c0 = arith.constant 0 : index
    %c0_0 = arith.constant 0 : index
    %c0_1 = arith.constant 0 : index
    %0 = vector.load %arg6[%c0, %c0_0, %c0_1] : memref<1x8x256xf32, #tpu.memory_space<vmem>>, vector<1x8x256xf32>
    %1 = vector.shape_cast %0 : vector<1x8x256xf32> to vector<8x256xf32>
    %2 = vector.extract_strided_slice %1 {offsets = [0, 0], sizes = [2, 256], strides = [1, 1]} : vector<8x256xf32> to vector<2x256xf32>
    %3 = vector.extract_strided_slice %1 {offsets = [2, 0], sizes = [2, 256], strides = [1, 1]} : vector<8x256xf32> to vector<2x256xf32>
    %4 = vector.extract_strided_slice %1 {offsets = [4, 0], sizes = [2, 256], strides = [1, 1]} : vector<8x256xf32> to vector<2x256xf32>
    %5 = vector.extract_strided_slice %1 {offsets = [6, 0], sizes = [2, 256], strides = [1, 1]} : vector<8x256xf32> to vector<2x256xf32>
    %c0_2 = arith.constant 0 : index
    %6 = memref.load %arg1[%c0_2] : memref<8xf32, #tpu.memory_space<smem>>
    %7 = vector.broadcast %6 : f32 to vector<2x256xf32>
    %8 = arith.mulf %7, %2 : vector<2x256xf32>
    %c1 = arith.constant 1 : index
    %9 = memref.load %arg1[%c1] : memref<8xf32, #tpu.memory_space<smem>>
    %10 = vector.broadcast %9 : f32 to vector<2x256xf32>
    %11 = arith.mulf %10, %3 : vector<2x256xf32>
    %c2 = arith.constant 2 : index
    %12 = memref.load %arg1[%c2] : memref<8xf32, #tpu.memory_space<smem>>
    %13 = vector.broadcast %12 : f32 to vector<2x256xf32>
    %14 = arith.mulf %13, %4 : vector<2x256xf32>
    %15 = arith.addf %8, %14 : vector<2x256xf32>
    %c3 = arith.constant 3 : index
    %16 = memref.load %arg1[%c3] : memref<8xf32, #tpu.memory_space<smem>>
    %17 = vector.broadcast %16 : f32 to vector<2x256xf32>
    %18 = arith.mulf %17, %5 : vector<2x256xf32>
    %19 = arith.addf %11, %18 : vector<2x256xf32>
    %20 = arith.addf %15, %19 : vector<2x256xf32>
    %c0_3 = arith.constant 0 : index
    %21 = memref.load %arg2[%c0_3] : memref<2xf32, #tpu.memory_space<smem>>
    %22 = vector.broadcast %21 : f32 to vector<2x256xf32>
    %23 = arith.addf %20, %22 : vector<2x256xf32>
    %c0_4 = arith.constant 0 : index
    %c0_5 = arith.constant 0 : index
    %24 = vector.load %arg8[%c0_4, %c0_5] : memref<4x256xf32, #tpu.memory_space<vmem>>, vector<2x256xf32>
    tpu.vector_store %arg8[%c0_4, %c0_5], %23 {strides = array<i32>} : memref<4x256xf32, #tpu.memory_space<vmem>>, vector<2x256xf32>,
    %c4 = arith.constant 4 : index
    %25 = memref.load %arg1[%c4] : memref<8xf32, #tpu.memory_space<smem>>
    %26 = vector.broadcast %25 : f32 to vector<2x256xf32>
    %27 = arith.mulf %26, %2 : vector<2x256xf32>
    %c5 = arith.constant 5 : index
    %28 = memref.load %arg1[%c5] : memref<8xf32, #tpu.memory_space<smem>>
    %29 = vector.broadcast %28 : f32 to vector<2x256xf32>
    %30 = arith.mulf %29, %3 : vector<2x256xf32>
    %c6 = arith.constant 6 : index
    %31 = memref.load %arg1[%c6] : memref<8xf32, #tpu.memory_space<smem>>
    %32 = vector.broadcast %31 : f32 to vector<2x256xf32>
    %33 = arith.mulf %32, %4 : vector<2x256xf32>
    %34 = arith.addf %27, %33 : vector<2x256xf32>
    %c7 = arith.constant 7 : index
    %35 = memref.load %arg1[%c7] : memref<8xf32, #tpu.memory_space<smem>>
    %36 = vector.broadcast %35 : f32 to vector<2x256xf32>
    %37 = arith.mulf %36, %5 : vector<2x256xf32>
    %38 = arith.addf %30, %37 : vector<2x256xf32>
    %39 = arith.addf %34, %38 : vector<2x256xf32>
    %c1_6 = arith.constant 1 : index
    %40 = memref.load %arg2[%c1_6] : memref<2xf32, #tpu.memory_space<smem>>
    %41 = vector.broadcast %40 : f32 to vector<2x256xf32>
    %42 = arith.addf %39, %41 : vector<2x256xf32>
    %c2_7 = arith.constant 2 : index
    %c0_8 = arith.constant 0 : index
    %43 = vector.load %arg8[%c2_7, %c0_8] : memref<4x256xf32, #tpu.memory_space<vmem>>, vector<2x256xf32>
    tpu.vector_store %arg8[%c2_7, %c0_8], %42 {strides = array<i32>} : memref<4x256xf32, #tpu.memory_space<vmem>>, vector<2x256xf32>,
    %c0_9 = arith.constant 0 : index
    %c0_10 = arith.constant 0 : index
    %44 = vector.load %arg8[%c0_9, %c0_10] : memref<4x256xf32, #tpu.memory_space<vmem>>, vector<4x256xf32>
    %cst = arith.constant 5.000000e-01 : f32
    %45 = vector.broadcast %cst : f32 to vector<4x256xf32>
    %46 = arith.mulf %45, %44 : vector<4x256xf32>
    %47 = math.tanh %46 : vector<4x256xf32>
    %cst_11 = arith.constant 1.000000e+00 : f32
    %48 = vector.broadcast %cst_11 : f32 to vector<4x256xf32>
    %49 = arith.addf %47, %48 : vector<4x256xf32>
    %cst_12 = arith.constant 5.000000e-01 : f32
    %50 = vector.broadcast %cst_12 : f32 to vector<4x256xf32>
    %51 = arith.mulf %50, %49 : vector<4x256xf32>
    %52 = arith.mulf %44, %51 : vector<4x256xf32>
    %53 = tpu.iota {dimensions = array<i32: 1>} : vector<4x256xi32>
    %c15_i32 = arith.constant 15 : i32
    %54 = vector.broadcast %c15_i32 : i32 to vector<4x256xi32>
    %55 = arith.andi %53, %54 : vector<4x256xi32>
    %c16_i32 = arith.constant 16 : i32
    %56 = vector.broadcast %c16_i32 : i32 to vector<4x256xi32>
    %57 = arith.cmpi sge, %53, %56 : vector<4x256xi32>
    %c240_i32 = arith.constant 240 : i32
    %58 = vector.broadcast %c240_i32 : i32 to vector<4x256xi32>
    %59 = arith.cmpi slt, %53, %58 : vector<4x256xi32>
    %c1_i32 = arith.constant 1 : i32
    %60 = vector.broadcast %c1_i32 : i32 to vector<4x256xi32>
    %61 = arith.cmpi sge, %55, %60 : vector<4x256xi32>
    %c15_i32_13 = arith.constant 15 : i32
    %62 = vector.broadcast %c15_i32_13 : i32 to vector<4x256xi32>
    %63 = arith.cmpi slt, %55, %62 : vector<4x256xi32>
    %64 = arith.andi %57, %61 : vector<4x256xi1>
    %65 = arith.andi %57, %63 : vector<4x256xi1>
    %66 = arith.andi %59, %61 : vector<4x256xi1>
    %67 = arith.andi %59, %63 : vector<4x256xi1>
    %c17_i32 = arith.constant 17 : i32
    %68 = tpu.dynamic_rotate %52 by %c17_i32 dim 1 : vector<4x256xf32>, i32 -> vector<4x256xf32>
    %cst_14 = arith.constant 0.000000e+00 : f32
    %69 = vector.broadcast %cst_14 : f32 to vector<4x256xf32>
    %70 = arith.select %64, %68, %69 : vector<4x256xi1>, vector<4x256xf32>
    %71 = vector.extract_strided_slice %70 {offsets = [0, 0], sizes = [2, 256], strides = [1, 1]} : vector<4x256xf32> to vector<2x256xf32>
    %c0_15 = arith.constant 0 : index
    %72 = memref.load %arg3[%c0_15] : memref<72xf32, #tpu.memory_space<smem>>
    %73 = vector.broadcast %72 : f32 to vector<2x256xf32>
    %74 = arith.mulf %73, %71 : vector<2x256xf32>
    %c18 = arith.constant 18 : index
    %75 = memref.load %arg3[%c18] : memref<72xf32, #tpu.memory_space<smem>>
    %76 = vector.broadcast %75 : f32 to vector<2x256xf32>
    %77 = arith.mulf %76, %71 : vector<2x256xf32>
    %c36 = arith.constant 36 : index
    %78 = memref.load %arg3[%c36] : memref<72xf32, #tpu.memory_space<smem>>
    %79 = vector.broadcast %78 : f32 to vector<2x256xf32>
    %80 = arith.mulf %79, %71 : vector<2x256xf32>
    %c54 = arith.constant 54 : index
    %81 = memref.load %arg3[%c54] : memref<72xf32, #tpu.memory_space<smem>>
    %82 = vector.broadcast %81 : f32 to vector<2x256xf32>
    %83 = arith.mulf %82, %71 : vector<2x256xf32>
    %84 = vector.extract_strided_slice %70 {offsets = [2, 0], sizes = [2, 256], strides = [1, 1]} : vector<4x256xf32> to vector<2x256xf32>
    %c9 = arith.constant 9 : index
    %85 = memref.load %arg3[%c9] : memref<72xf32, #tpu.memory_space<smem>>
    %86 = vector.broadcast %85 : f32 to vector<2x256xf32>
    %87 = arith.mulf %86, %84 : vector<2x256xf32>
    %c27 = arith.constant 27 : index
    %88 = memref.load %arg3[%c27] : memref<72xf32, #tpu.memory_space<smem>>
    %89 = vector.broadcast %88 : f32 to vector<2x256xf32>
    %90 = arith.mulf %89, %84 : vector<2x256xf32>
    %c45 = arith.constant 45 : index
    %91 = memref.load %arg3[%c45] : memref<72xf32, #tpu.memory_space<smem>>
    %92 = vector.broadcast %91 : f32 to vector<2x256xf32>
    %93 = arith.mulf %92, %84 : vector<2x256xf32>
    %c63 = arith.constant 63 : index
    %94 = memref.load %arg3[%c63] : memref<72xf32, #tpu.memory_space<smem>>
    %95 = vector.broadcast %94 : f32 to vector<2x256xf32>
    %96 = arith.mulf %95, %84 : vector<2x256xf32>
    %c16_i32_16 = arith.constant 16 : i32
    %97 = tpu.dynamic_rotate %52 by %c16_i32_16 dim 1 : vector<4x256xf32>, i32 -> vector<4x256xf32>
    %cst_17 = arith.constant 0.000000e+00 : f32
    %98 = vector.broadcast %cst_17 : f32 to vector<4x256xf32>
    %99 = arith.select %57, %97, %98 : vector<4x256xi1>, vector<4x256xf32>
    %100 = vector.extract_strided_slice %99 {offsets = [0, 0], sizes = [2, 256], strides = [1, 1]} : vector<4x256xf32> to vector<2x256xf32>
    %c1_18 = arith.constant 1 : index
    %101 = memref.load %arg3[%c1_18] : memref<72xf32, #tpu.memory_space<smem>>
    %102 = vector.broadcast %101 : f32 to vector<2x256xf32>
    %103 = arith.mulf %102, %100 : vector<2x256xf32>
    %104 = arith.addf %74, %103 : vector<2x256xf32>
    %c19 = arith.constant 19 : index
    %105 = memref.load %arg3[%c19] : memref<72xf32, #tpu.memory_space<smem>>
    %106 = vector.broadcast %105 : f32 to vector<2x256xf32>
    %107 = arith.mulf %106, %100 : vector<2x256xf32>
    %108 = arith.addf %77, %107 : vector<2x256xf32>
    %c37 = arith.constant 37 : index
    %109 = memref.load %arg3[%c37] : memref<72xf32, #tpu.memory_space<smem>>
    %110 = vector.broadcast %109 : f32 to vector<2x256xf32>
    %111 = arith.mulf %110, %100 : vector<2x256xf32>
    %112 = arith.addf %80, %111 : vector<2x256xf32>
    %c55 = arith.constant 55 : index
    %113 = memref.load %arg3[%c55] : memref<72xf32, #tpu.memory_space<smem>>
    %114 = vector.broadcast %113 : f32 to vector<2x256xf32>
    %115 = arith.mulf %114, %100 : vector<2x256xf32>
    %116 = arith.addf %83, %115 : vector<2x256xf32>
    %117 = vector.extract_strided_slice %99 {offsets = [2, 0], sizes = [2, 256], strides = [1, 1]} : vector<4x256xf32> to vector<2x256xf32>
    %c10 = arith.constant 10 : index
    %118 = memref.load %arg3[%c10] : memref<72xf32, #tpu.memory_space<smem>>
    %119 = vector.broadcast %118 : f32 to vector<2x256xf32>
    %120 = arith.mulf %119, %117 : vector<2x256xf32>
    %121 = arith.addf %87, %120 : vector<2x256xf32>
    %c28 = arith.constant 28 : index
    %122 = memref.load %arg3[%c28] : memref<72xf32, #tpu.memory_space<smem>>
    %123 = vector.broadcast %122 : f32 to vector<2x256xf32>
    %124 = arith.mulf %123, %117 : vector<2x256xf32>
    %125 = arith.addf %90, %124 : vector<2x256xf32>
    %c46 = arith.constant 46 : index
    %126 = memref.load %arg3[%c46] : memref<72xf32, #tpu.memory_space<smem>>
    %127 = vector.broadcast %126 : f32 to vector<2x256xf32>
    %128 = arith.mulf %127, %117 : vector<2x256xf32>
    %129 = arith.addf %93, %128 : vector<2x256xf32>
    %c64 = arith.constant 64 : index
    %130 = memref.load %arg3[%c64] : memref<72xf32, #tpu.memory_space<smem>>
    %131 = vector.broadcast %130 : f32 to vector<2x256xf32>
    %132 = arith.mulf %131, %117 : vector<2x256xf32>
    %133 = arith.addf %96, %132 : vector<2x256xf32>
    %c15_i32_19 = arith.constant 15 : i32
    %134 = tpu.dynamic_rotate %52 by %c15_i32_19 dim 1 : vector<4x256xf32>, i32 -> vector<4x256xf32>
    %cst_20 = arith.constant 0.000000e+00 : f32
    %135 = vector.broadcast %cst_20 : f32 to vector<4x256xf32>
    %136 = arith.select %65, %134, %135 : vector<4x256xi1>, vector<4x256xf32>
    %137 = vector.extract_strided_slice %136 {offsets = [0, 0], sizes = [2, 256], strides = [1, 1]} : vector<4x256xf32> to vector<2x256xf32>
    %c2_21 = arith.constant 2 : index
    %138 = memref.load %arg3[%c2_21] : memref<72xf32, #tpu.memory_space<smem>>
    %139 = vector.broadcast %138 : f32 to vector<2x256xf32>
    %140 = arith.mulf %139, %137 : vector<2x256xf32>
    %141 = arith.addf %104, %140 : vector<2x256xf32>
    %c20 = arith.constant 20 : index
    %142 = memref.load %arg3[%c20] : memref<72xf32, #tpu.memory_space<smem>>
    %143 = vector.broadcast %142 : f32 to vector<2x256xf32>
    %144 = arith.mulf %143, %137 : vector<2x256xf32>
    %145 = arith.addf %108, %144 : vector<2x256xf32>
    %c38 = arith.constant 38 : index
    %146 = memref.load %arg3[%c38] : memref<72xf32, #tpu.memory_space<smem>>
    %147 = vector.broadcast %146 : f32 to vector<2x256xf32>
    %148 = arith.mulf %147, %137 : vector<2x256xf32>
    %149 = arith.addf %112, %148 : vector<2x256xf32>
    %c56 = arith.constant 56 : index
    %150 = memref.load %arg3[%c56] : memref<72xf32, #tpu.memory_space<smem>>
    %151 = vector.broadcast %150 : f32 to vector<2x256xf32>
    %152 = arith.mulf %151, %137 : vector<2x256xf32>
    %153 = arith.addf %116, %152 : vector<2x256xf32>
    %154 = vector.extract_strided_slice %136 {offsets = [2, 0], sizes = [2, 256], strides = [1, 1]} : vector<4x256xf32> to vector<2x256xf32>
    %c11 = arith.constant 11 : index
    %155 = memref.load %arg3[%c11] : memref<72xf32, #tpu.memory_space<smem>>
    %156 = vector.broadcast %155 : f32 to vector<2x256xf32>
    %157 = arith.mulf %156, %154 : vector<2x256xf32>
    %158 = arith.addf %121, %157 : vector<2x256xf32>
    %c29 = arith.constant 29 : index
    %159 = memref.load %arg3[%c29] : memref<72xf32, #tpu.memory_space<smem>>
    %160 = vector.broadcast %159 : f32 to vector<2x256xf32>
    %161 = arith.mulf %160, %154 : vector<2x256xf32>
    %162 = arith.addf %125, %161 : vector<2x256xf32>
    %c47 = arith.constant 47 : index
    %163 = memref.load %arg3[%c47] : memref<72xf32, #tpu.memory_space<smem>>
    %164 = vector.broadcast %163 : f32 to vector<2x256xf32>
    %165 = arith.mulf %164, %154 : vector<2x256xf32>
    %166 = arith.addf %129, %165 : vector<2x256xf32>
    %c65 = arith.constant 65 : index
    %167 = memref.load %arg3[%c65] : memref<72xf32, #tpu.memory_space<smem>>
    %168 = vector.broadcast %167 : f32 to vector<2x256xf32>
    %169 = arith.mulf %168, %154 : vector<2x256xf32>
    %170 = arith.addf %133, %169 : vector<2x256xf32>
    %c1_i32_22 = arith.constant 1 : i32
    %171 = tpu.dynamic_rotate %52 by %c1_i32_22 dim 1 : vector<4x256xf32>, i32 -> vector<4x256xf32>
    %cst_23 = arith.constant 0.000000e+00 : f32
    %172 = vector.broadcast %cst_23 : f32 to vector<4x256xf32>
    %173 = arith.select %61, %171, %172 : vector<4x256xi1>, vector<4x256xf32>
    %174 = vector.extract_strided_slice %173 {offsets = [0, 0], sizes = [2, 256], strides = [1, 1]} : vector<4x256xf32> to vector<2x256xf32>
    %c3_24 = arith.constant 3 : index
    %175 = memref.load %arg3[%c3_24] : memref<72xf32, #tpu.memory_space<smem>>
    %176 = vector.broadcast %175 : f32 to vector<2x256xf32>
    %177 = arith.mulf %176, %174 : vector<2x256xf32>
    %178 = arith.addf %141, %177 : vector<2x256xf32>
    %c21 = arith.constant 21 : index
    %179 = memref.load %arg3[%c21] : memref<72xf32, #tpu.memory_space<smem>>
    %180 = vector.broadcast %179 : f32 to vector<2x256xf32>
    %181 = arith.mulf %180, %174 : vector<2x256xf32>
    %182 = arith.addf %145, %181 : vector<2x256xf32>
    %c39 = arith.constant 39 : index
    %183 = memref.load %arg3[%c39] : memref<72xf32, #tpu.memory_space<smem>>
    %184 = vector.broadcast %183 : f32 to vector<2x256xf32>
    %185 = arith.mulf %184, %174 : vector<2x256xf32>
    %186 = arith.addf %149, %185 : vector<2x256xf32>
    %c57 = arith.constant 57 : index
    %187 = memref.load %arg3[%c57] : memref<72xf32, #tpu.memory_space<smem>>
    %188 = vector.broadcast %187 : f32 to vector<2x256xf32>
    %189 = arith.mulf %188, %174 : vector<2x256xf32>
    %190 = arith.addf %153, %189 : vector<2x256xf32>
    %191 = vector.extract_strided_slice %173 {offsets = [2, 0], sizes = [2, 256], strides = [1, 1]} : vector<4x256xf32> to vector<2x256xf32>
    %c12 = arith.constant 12 : index
    %192 = memref.load %arg3[%c12] : memref<72xf32, #tpu.memory_space<smem>>
    %193 = vector.broadcast %192 : f32 to vector<2x256xf32>
    %194 = arith.mulf %193, %191 : vector<2x256xf32>
    %195 = arith.addf %158, %194 : vector<2x256xf32>
    %c30 = arith.constant 30 : index
    %196 = memref.load %arg3[%c30] : memref<72xf32, #tpu.memory_space<smem>>
    %197 = vector.broadcast %196 : f32 to vector<2x256xf32>
    %198 = arith.mulf %197, %191 : vector<2x256xf32>
    %199 = arith.addf %162, %198 : vector<2x256xf32>
    %c48 = arith.constant 48 : index
    %200 = memref.load %arg3[%c48] : memref<72xf32, #tpu.memory_space<smem>>
    %201 = vector.broadcast %200 : f32 to vector<2x256xf32>
    %202 = arith.mulf %201, %191 : vector<2x256xf32>
    %203 = arith.addf %166, %202 : vector<2x256xf32>
    %c66 = arith.constant 66 : index
    %204 = memref.load %arg3[%c66] : memref<72xf32, #tpu.memory_space<smem>>
    %205 = vector.broadcast %204 : f32 to vector<2x256xf32>
    %206 = arith.mulf %205, %191 : vector<2x256xf32>
    %207 = arith.addf %170, %206 : vector<2x256xf32>
    %208 = vector.extract_strided_slice %52 {offsets = [0, 0], sizes = [2, 256], strides = [1, 1]} : vector<4x256xf32> to vector<2x256xf32>
    %c4_25 = arith.constant 4 : index
    %209 = memref.load %arg3[%c4_25] : memref<72xf32, #tpu.memory_space<smem>>
    %210 = vector.broadcast %209 : f32 to vector<2x256xf32>
    %211 = arith.mulf %210, %208 : vector<2x256xf32>
    %212 = arith.addf %178, %211 : vector<2x256xf32>
    %c22 = arith.constant 22 : index
    %213 = memref.load %arg3[%c22] : memref<72xf32, #tpu.memory_space<smem>>
    %214 = vector.broadcast %213 : f32 to vector<2x256xf32>
    %215 = arith.mulf %214, %208 : vector<2x256xf32>
    %216 = arith.addf %182, %215 : vector<2x256xf32>
    %c40 = arith.constant 40 : index
    %217 = memref.load %arg3[%c40] : memref<72xf32, #tpu.memory_space<smem>>
    %218 = vector.broadcast %217 : f32 to vector<2x256xf32>
    %219 = arith.mulf %218, %208 : vector<2x256xf32>
    %220 = arith.addf %186, %219 : vector<2x256xf32>
    %c58 = arith.constant 58 : index
    %221 = memref.load %arg3[%c58] : memref<72xf32, #tpu.memory_space<smem>>
    %222 = vector.broadcast %221 : f32 to vector<2x256xf32>
    %223 = arith.mulf %222, %208 : vector<2x256xf32>
    %224 = arith.addf %190, %223 : vector<2x256xf32>
    %225 = vector.extract_strided_slice %52 {offsets = [2, 0], sizes = [2, 256], strides = [1, 1]} : vector<4x256xf32> to vector<2x256xf32>
    %c13 = arith.constant 13 : index
    %226 = memref.load %arg3[%c13] : memref<72xf32, #tpu.memory_space<smem>>
    %227 = vector.broadcast %226 : f32 to vector<2x256xf32>
    %228 = arith.mulf %227, %225 : vector<2x256xf32>
    %229 = arith.addf %195, %228 : vector<2x256xf32>
    %c31 = arith.constant 31 : index
    %230 = memref.load %arg3[%c31] : memref<72xf32, #tpu.memory_space<smem>>
    %231 = vector.broadcast %230 : f32 to vector<2x256xf32>
    %232 = arith.mulf %231, %225 : vector<2x256xf32>
    %233 = arith.addf %199, %232 : vector<2x256xf32>
    %c49 = arith.constant 49 : index
    %234 = memref.load %arg3[%c49] : memref<72xf32, #tpu.memory_space<smem>>
    %235 = vector.broadcast %234 : f32 to vector<2x256xf32>
    %236 = arith.mulf %235, %225 : vector<2x256xf32>
    %237 = arith.addf %203, %236 : vector<2x256xf32>
    %c67 = arith.constant 67 : index
    %238 = memref.load %arg3[%c67] : memref<72xf32, #tpu.memory_space<smem>>
    %239 = vector.broadcast %238 : f32 to vector<2x256xf32>
    %240 = arith.mulf %239, %225 : vector<2x256xf32>
    %241 = arith.addf %207, %240 : vector<2x256xf32>
    %c255_i32 = arith.constant 255 : i32
    %242 = tpu.dynamic_rotate %52 by %c255_i32 dim 1 : vector<4x256xf32>, i32 -> vector<4x256xf32>
    %cst_26 = arith.constant 0.000000e+00 : f32
    %243 = vector.broadcast %cst_26 : f32 to vector<4x256xf32>
    %244 = arith.select %63, %242, %243 : vector<4x256xi1>, vector<4x256xf32>
    %245 = vector.extract_strided_slice %244 {offsets = [0, 0], sizes = [2, 256], strides = [1, 1]} : vector<4x256xf32> to vector<2x256xf32>
    %c5_27 = arith.constant 5 : index
    %246 = memref.load %arg3[%c5_27] : memref<72xf32, #tpu.memory_space<smem>>
    %247 = vector.broadcast %246 : f32 to vector<2x256xf32>
    %248 = arith.mulf %247, %245 : vector<2x256xf32>
    %249 = arith.addf %212, %248 : vector<2x256xf32>
    %c23 = arith.constant 23 : index
    %250 = memref.load %arg3[%c23] : memref<72xf32, #tpu.memory_space<smem>>
    %251 = vector.broadcast %250 : f32 to vector<2x256xf32>
    %252 = arith.mulf %251, %245 : vector<2x256xf32>
    %253 = arith.addf %216, %252 : vector<2x256xf32>
    %c41 = arith.constant 41 : index
    %254 = memref.load %arg3[%c41] : memref<72xf32, #tpu.memory_space<smem>>
    %255 = vector.broadcast %254 : f32 to vector<2x256xf32>
    %256 = arith.mulf %255, %245 : vector<2x256xf32>
    %257 = arith.addf %220, %256 : vector<2x256xf32>
    %c59 = arith.constant 59 : index
    %258 = memref.load %arg3[%c59] : memref<72xf32, #tpu.memory_space<smem>>
    %259 = vector.broadcast %258 : f32 to vector<2x256xf32>
    %260 = arith.mulf %259, %245 : vector<2x256xf32>
    %261 = arith.addf %224, %260 : vector<2x256xf32>
    %262 = vector.extract_strided_slice %244 {offsets = [2, 0], sizes = [2, 256], strides = [1, 1]} : vector<4x256xf32> to vector<2x256xf32>
    %c14 = arith.constant 14 : index
    %263 = memref.load %arg3[%c14] : memref<72xf32, #tpu.memory_space<smem>>
    %264 = vector.broadcast %263 : f32 to vector<2x256xf32>
    %265 = arith.mulf %264, %262 : vector<2x256xf32>
    %266 = arith.addf %229, %265 : vector<2x256xf32>
    %c32 = arith.constant 32 : index
    %267 = memref.load %arg3[%c32] : memref<72xf32, #tpu.memory_space<smem>>
    %268 = vector.broadcast %267 : f32 to vector<2x256xf32>
    %269 = arith.mulf %268, %262 : vector<2x256xf32>
    %270 = arith.addf %233, %269 : vector<2x256xf32>
    %c50 = arith.constant 50 : index
    %271 = memref.load %arg3[%c50] : memref<72xf32, #tpu.memory_space<smem>>
    %272 = vector.broadcast %271 : f32 to vector<2x256xf32>
    %273 = arith.mulf %272, %262 : vector<2x256xf32>
    %274 = arith.addf %237, %273 : vector<2x256xf32>
    %c68 = arith.constant 68 : index
    %275 = memref.load %arg3[%c68] : memref<72xf32, #tpu.memory_space<smem>>
    %276 = vector.broadcast %275 : f32 to vector<2x256xf32>
    %277 = arith.mulf %276, %262 : vector<2x256xf32>
    %278 = arith.addf %241, %277 : vector<2x256xf32>
    %c241_i32 = arith.constant 241 : i32
    %279 = tpu.dynamic_rotate %52 by %c241_i32 dim 1 : vector<4x256xf32>, i32 -> vector<4x256xf32>
    %cst_28 = arith.constant 0.000000e+00 : f32
    %280 = vector.broadcast %cst_28 : f32 to vector<4x256xf32>
    %281 = arith.select %66, %279, %280 : vector<4x256xi1>, vector<4x256xf32>
    %282 = vector.extract_strided_slice %281 {offsets = [0, 0], sizes = [2, 256], strides = [1, 1]} : vector<4x256xf32> to vector<2x256xf32>
    %c6_29 = arith.constant 6 : index
    %283 = memref.load %arg3[%c6_29] : memref<72xf32, #tpu.memory_space<smem>>
    %284 = vector.broadcast %283 : f32 to vector<2x256xf32>
    %285 = arith.mulf %284, %282 : vector<2x256xf32>
    %286 = arith.addf %249, %285 : vector<2x256xf32>
    %c24 = arith.constant 24 : index
    %287 = memref.load %arg3[%c24] : memref<72xf32, #tpu.memory_space<smem>>
    %288 = vector.broadcast %287 : f32 to vector<2x256xf32>
    %289 = arith.mulf %288, %282 : vector<2x256xf32>
    %290 = arith.addf %253, %289 : vector<2x256xf32>
    %c42 = arith.constant 42 : index
    %291 = memref.load %arg3[%c42] : memref<72xf32, #tpu.memory_space<smem>>
    %292 = vector.broadcast %291 : f32 to vector<2x256xf32>
    %293 = arith.mulf %292, %282 : vector<2x256xf32>
    %294 = arith.addf %257, %293 : vector<2x256xf32>
    %c60 = arith.constant 60 : index
    %295 = memref.load %arg3[%c60] : memref<72xf32, #tpu.memory_space<smem>>
    %296 = vector.broadcast %295 : f32 to vector<2x256xf32>
    %297 = arith.mulf %296, %282 : vector<2x256xf32>
    %298 = arith.addf %261, %297 : vector<2x256xf32>
    %299 = vector.extract_strided_slice %281 {offsets = [2, 0], sizes = [2, 256], strides = [1, 1]} : vector<4x256xf32> to vector<2x256xf32>
    %c15 = arith.constant 15 : index
    %300 = memref.load %arg3[%c15] : memref<72xf32, #tpu.memory_space<smem>>
    %301 = vector.broadcast %300 : f32 to vector<2x256xf32>
    %302 = arith.mulf %301, %299 : vector<2x256xf32>
    %303 = arith.addf %266, %302 : vector<2x256xf32>
    %c33 = arith.constant 33 : index
    %304 = memref.load %arg3[%c33] : memref<72xf32, #tpu.memory_space<smem>>
    %305 = vector.broadcast %304 : f32 to vector<2x256xf32>
    %306 = arith.mulf %305, %299 : vector<2x256xf32>
    %307 = arith.addf %270, %306 : vector<2x256xf32>
    %c51 = arith.constant 51 : index
    %308 = memref.load %arg3[%c51] : memref<72xf32, #tpu.memory_space<smem>>
    %309 = vector.broadcast %308 : f32 to vector<2x256xf32>
    %310 = arith.mulf %309, %299 : vector<2x256xf32>
    %311 = arith.addf %274, %310 : vector<2x256xf32>
    %c69 = arith.constant 69 : index
    %312 = memref.load %arg3[%c69] : memref<72xf32, #tpu.memory_space<smem>>
    %313 = vector.broadcast %312 : f32 to vector<2x256xf32>
    %314 = arith.mulf %313, %299 : vector<2x256xf32>
    %315 = arith.addf %278, %314 : vector<2x256xf32>
    %c240_i32_30 = arith.constant 240 : i32
    %316 = tpu.dynamic_rotate %52 by %c240_i32_30 dim 1 : vector<4x256xf32>, i32 -> vector<4x256xf32>
    %cst_31 = arith.constant 0.000000e+00 : f32
    %317 = vector.broadcast %cst_31 : f32 to vector<4x256xf32>
    %318 = arith.select %59, %316, %317 : vector<4x256xi1>, vector<4x256xf32>
    %319 = vector.extract_strided_slice %318 {offsets = [0, 0], sizes = [2, 256], strides = [1, 1]} : vector<4x256xf32> to vector<2x256xf32>
    %c7_32 = arith.constant 7 : index
    %320 = memref.load %arg3[%c7_32] : memref<72xf32, #tpu.memory_space<smem>>
    %321 = vector.broadcast %320 : f32 to vector<2x256xf32>
    %322 = arith.mulf %321, %319 : vector<2x256xf32>
    %323 = arith.addf %286, %322 : vector<2x256xf32>
    %c25 = arith.constant 25 : index
    %324 = memref.load %arg3[%c25] : memref<72xf32, #tpu.memory_space<smem>>
    %325 = vector.broadcast %324 : f32 to vector<2x256xf32>
    %326 = arith.mulf %325, %319 : vector<2x256xf32>
    %327 = arith.addf %290, %326 : vector<2x256xf32>
    %c43 = arith.constant 43 : index
    %328 = memref.load %arg3[%c43] : memref<72xf32, #tpu.memory_space<smem>>
    %329 = vector.broadcast %328 : f32 to vector<2x256xf32>
    %330 = arith.mulf %329, %319 : vector<2x256xf32>
    %331 = arith.addf %294, %330 : vector<2x256xf32>
    %c61 = arith.constant 61 : index
    %332 = memref.load %arg3[%c61] : memref<72xf32, #tpu.memory_space<smem>>
    %333 = vector.broadcast %332 : f32 to vector<2x256xf32>
    %334 = arith.mulf %333, %319 : vector<2x256xf32>
    %335 = arith.addf %298, %334 : vector<2x256xf32>
    %336 = vector.extract_strided_slice %318 {offsets = [2, 0], sizes = [2, 256], strides = [1, 1]} : vector<4x256xf32> to vector<2x256xf32>
    %c16 = arith.constant 16 : index
    %337 = memref.load %arg3[%c16] : memref<72xf32, #tpu.memory_space<smem>>
    %338 = vector.broadcast %337 : f32 to vector<2x256xf32>
    %339 = arith.mulf %338, %336 : vector<2x256xf32>
    %340 = arith.addf %303, %339 : vector<2x256xf32>
    %c34 = arith.constant 34 : index
    %341 = memref.load %arg3[%c34] : memref<72xf32, #tpu.memory_space<smem>>
    %342 = vector.broadcast %341 : f32 to vector<2x256xf32>
    %343 = arith.mulf %342, %336 : vector<2x256xf32>
    %344 = arith.addf %307, %343 : vector<2x256xf32>
    %c52 = arith.constant 52 : index
    %345 = memref.load %arg3[%c52] : memref<72xf32, #tpu.memory_space<smem>>
    %346 = vector.broadcast %345 : f32 to vector<2x256xf32>
    %347 = arith.mulf %346, %336 : vector<2x256xf32>
    %348 = arith.addf %311, %347 : vector<2x256xf32>
    %c70 = arith.constant 70 : index
    %349 = memref.load %arg3[%c70] : memref<72xf32, #tpu.memory_space<smem>>
    %350 = vector.broadcast %349 : f32 to vector<2x256xf32>
    %351 = arith.mulf %350, %336 : vector<2x256xf32>
    %352 = arith.addf %315, %351 : vector<2x256xf32>
    %c239_i32 = arith.constant 239 : i32
    %353 = tpu.dynamic_rotate %52 by %c239_i32 dim 1 : vector<4x256xf32>, i32 -> vector<4x256xf32>
    %cst_33 = arith.constant 0.000000e+00 : f32
    %354 = vector.broadcast %cst_33 : f32 to vector<4x256xf32>
    %355 = arith.select %67, %353, %354 : vector<4x256xi1>, vector<4x256xf32>
    %356 = vector.extract_strided_slice %355 {offsets = [0, 0], sizes = [2, 256], strides = [1, 1]} : vector<4x256xf32> to vector<2x256xf32>
    %c8 = arith.constant 8 : index
    %357 = memref.load %arg3[%c8] : memref<72xf32, #tpu.memory_space<smem>>
    %358 = vector.broadcast %357 : f32 to vector<2x256xf32>
    %359 = arith.mulf %358, %356 : vector<2x256xf32>
    %360 = arith.addf %323, %359 : vector<2x256xf32>
    %c26 = arith.constant 26 : index
    %361 = memref.load %arg3[%c26] : memref<72xf32, #tpu.memory_space<smem>>
    %362 = vector.broadcast %361 : f32 to vector<2x256xf32>
    %363 = arith.mulf %362, %356 : vector<2x256xf32>
    %364 = arith.addf %327, %363 : vector<2x256xf32>
    %c44 = arith.constant 44 : index
    %365 = memref.load %arg3[%c44] : memref<72xf32, #tpu.memory_space<smem>>
    %366 = vector.broadcast %365 : f32 to vector<2x256xf32>
    %367 = arith.mulf %366, %356 : vector<2x256xf32>
    %368 = arith.addf %331, %367 : vector<2x256xf32>
    %c62 = arith.constant 62 : index
    %369 = memref.load %arg3[%c62] : memref<72xf32, #tpu.memory_space<smem>>
    %370 = vector.broadcast %369 : f32 to vector<2x256xf32>
    %371 = arith.mulf %370, %356 : vector<2x256xf32>
    %372 = arith.addf %335, %371 : vector<2x256xf32>
    %373 = vector.extract_strided_slice %355 {offsets = [2, 0], sizes = [2, 256], strides = [1, 1]} : vector<4x256xf32> to vector<2x256xf32>
    %c17 = arith.constant 17 : index
    %374 = memref.load %arg3[%c17] : memref<72xf32, #tpu.memory_space<smem>>
    %375 = vector.broadcast %374 : f32 to vector<2x256xf32>
    %376 = arith.mulf %375, %373 : vector<2x256xf32>
    %377 = arith.addf %340, %376 : vector<2x256xf32>
    %c35 = arith.constant 35 : index
    %378 = memref.load %arg3[%c35] : memref<72xf32, #tpu.memory_space<smem>>
    %379 = vector.broadcast %378 : f32 to vector<2x256xf32>
    %380 = arith.mulf %379, %373 : vector<2x256xf32>
    %381 = arith.addf %344, %380 : vector<2x256xf32>
    %c53 = arith.constant 53 : index
    %382 = memref.load %arg3[%c53] : memref<72xf32, #tpu.memory_space<smem>>
    %383 = vector.broadcast %382 : f32 to vector<2x256xf32>
    %384 = arith.mulf %383, %373 : vector<2x256xf32>
    %385 = arith.addf %348, %384 : vector<2x256xf32>
    %c71 = arith.constant 71 : index
    %386 = memref.load %arg3[%c71] : memref<72xf32, #tpu.memory_space<smem>>
    %387 = vector.broadcast %386 : f32 to vector<2x256xf32>
    %388 = arith.mulf %387, %373 : vector<2x256xf32>
    %389 = arith.addf %352, %388 : vector<2x256xf32>
    %390 = arith.addf %360, %377 : vector<2x256xf32>
    %c0_34 = arith.constant 0 : index
    %391 = memref.load %arg4[%c0_34] : memref<4xf32, #tpu.memory_space<smem>>
    %392 = vector.broadcast %391 : f32 to vector<2x256xf32>
    %393 = arith.addf %390, %392 : vector<2x256xf32>
    %c0_35 = arith.constant 0 : index
    %c0_36 = arith.constant 0 : index
    %394 = vector.load %arg9[%c0_35, %c0_36] : memref<8x256xf32, #tpu.memory_space<vmem>>, vector<2x256xf32>
    tpu.vector_store %arg9[%c0_35, %c0_36], %393 {strides = array<i32>} : memref<8x256xf32, #tpu.memory_space<vmem>>, vector<2x256xf32>,
    %395 = arith.addf %364, %381 : vector<2x256xf32>
    %c1_37 = arith.constant 1 : index
    %396 = memref.load %arg4[%c1_37] : memref<4xf32, #tpu.memory_space<smem>>
    %397 = vector.broadcast %396 : f32 to vector<2x256xf32>
    %398 = arith.addf %395, %397 : vector<2x256xf32>
    %c2_38 = arith.constant 2 : index
    %c0_39 = arith.constant 0 : index
    %399 = vector.load %arg9[%c2_38, %c0_39] : memref<8x256xf32, #tpu.memory_space<vmem>>, vector<2x256xf32>
    tpu.vector_store %arg9[%c2_38, %c0_39], %398 {strides = array<i32>} : memref<8x256xf32, #tpu.memory_space<vmem>>, vector<2x256xf32>,
    %400 = arith.addf %368, %385 : vector<2x256xf32>
    %c2_40 = arith.constant 2 : index
    %401 = memref.load %arg4[%c2_40] : memref<4xf32, #tpu.memory_space<smem>>
    %402 = vector.broadcast %401 : f32 to vector<2x256xf32>
    %403 = arith.addf %400, %402 : vector<2x256xf32>
    %c4_41 = arith.constant 4 : index
    %c0_42 = arith.constant 0 : index
    %404 = vector.load %arg9[%c4_41, %c0_42] : memref<8x256xf32, #tpu.memory_space<vmem>>, vector<2x256xf32>
    tpu.vector_store %arg9[%c4_41, %c0_42], %403 {strides = array<i32>} : memref<8x256xf32, #tpu.memory_space<vmem>>, vector<2x256xf32>,
    %405 = arith.addf %372, %389 : vector<2x256xf32>
    %c3_43 = arith.constant 3 : index
    %406 = memref.load %arg4[%c3_43] : memref<4xf32, #tpu.memory_space<smem>>
    %407 = vector.broadcast %406 : f32 to vector<2x256xf32>
    %408 = arith.addf %405, %407 : vector<2x256xf32>
    %c6_44 = arith.constant 6 : index
    %c0_45 = arith.constant 0 : index
    %409 = vector.load %arg9[%c6_44, %c0_45] : memref<8x256xf32, #tpu.memory_space<vmem>>, vector<2x256xf32>
    tpu.vector_store %arg9[%c6_44, %c0_45], %408 {strides = array<i32>} : memref<8x256xf32, #tpu.memory_space<vmem>>, vector<2x256xf32>,
    %c0_46 = arith.constant 0 : index
    %c0_47 = arith.constant 0 : index
    %410 = vector.load %arg9[%c0_46, %c0_47] : memref<8x256xf32, #tpu.memory_space<vmem>>, vector<8x256xf32>
    %cst_48 = arith.constant 5.000000e-01 : f32
    %411 = vector.broadcast %cst_48 : f32 to vector<8x256xf32>
    %412 = arith.mulf %411, %410 : vector<8x256xf32>
    %413 = math.tanh %412 : vector<8x256xf32>
    %cst_49 = arith.constant 1.000000e+00 : f32
    %414 = vector.broadcast %cst_49 : f32 to vector<8x256xf32>
    %415 = arith.addf %413, %414 : vector<8x256xf32>
    %cst_50 = arith.constant 5.000000e-01 : f32
    %416 = vector.broadcast %cst_50 : f32 to vector<8x256xf32>
    %417 = arith.mulf %416, %415 : vector<8x256xf32>
    %418 = arith.mulf %410, %417 : vector<8x256xf32>
    %cst_51 = arith.constant dense<0.000000e+00> : vector<8xf32>
    %419 = vector.multi_reduction <add>, %418, %cst_51 [1] : vector<8x256xf32> to vector<8xf32>
    %420 = vector.shape_cast %419 : vector<8xf32> to vector<8x1xf32>
    %cst_52 = arith.constant 3.906250e-03 : f32
    %421 = vector.broadcast %cst_52 : f32 to vector<8x1xf32>
    %422 = arith.mulf %420, %421 : vector<8x1xf32>
    %cst_53 = arith.constant 0.000000e+00 : f32
    %423 = vector.broadcast %cst_53 : f32 to vector<2x1xf32>
    %c0_54 = arith.constant 0 : index
    %c0_55 = arith.constant 0 : index
    %424 = vector.load %arg10[%c0_54, %c0_55] : memref<12x1xf32, #tpu.memory_space<vmem>>, vector<2x1xf32>
    tpu.vector_store %arg10[%c0_54, %c0_55], %423 {strides = array<i32>} : memref<12x1xf32, #tpu.memory_space<vmem>>, vector<2x1xf32>,
    %c2_56 = arith.constant 2 : index
    %c0_57 = arith.constant 0 : index
    %425 = vector.load %arg10[%c2_56, %c0_57] : memref<12x1xf32, #tpu.memory_space<vmem>>, vector<8x1xf32>
    tpu.vector_store %arg10[%c2_56, %c0_57], %422 {strides = array<i32>} : memref<12x1xf32, #tpu.memory_space<vmem>>, vector<8x1xf32>,
    %c10_58 = arith.constant 10 : index
    %c0_59 = arith.constant 0 : index
    %426 = vector.load %arg10[%c10_58, %c0_59] : memref<12x1xf32, #tpu.memory_space<vmem>>, vector<2x1xf32>
    tpu.vector_store %arg10[%c10_58, %c0_59], %423 {strides = array<i32>} : memref<12x1xf32, #tpu.memory_space<vmem>>, vector<2x1xf32>,
    %c0_60 = arith.constant 0 : index
    %c0_61 = arith.constant 0 : index
    %427 = vector.load %arg10[%c0_60, %c0_61] : memref<12x1xf32, #tpu.memory_space<vmem>>, vector<8x1xf32>
    %c4_62 = arith.constant 4 : index
    %c0_63 = arith.constant 0 : index
    %428 = vector.load %arg10[%c4_62, %c0_63] : memref<12x1xf32, #tpu.memory_space<vmem>>, vector<8x1xf32>
    %c0_64 = arith.constant 0 : index
    %429 = memref.load %arg5[%c0_64] : memref<3xf32, #tpu.memory_space<smem>>
    %430 = vector.broadcast %429 : f32 to vector<8x1xf32>
    %431 = arith.mulf %430, %427 : vector<8x1xf32>
    %c1_65 = arith.constant 1 : index
    %432 = memref.load %arg5[%c1_65] : memref<3xf32, #tpu.memory_space<smem>>
    %433 = vector.broadcast %432 : f32 to vector<8x1xf32>
    %434 = arith.mulf %433, %422 : vector<8x1xf32>
    %435 = arith.addf %431, %434 : vector<8x1xf32>
    %c2_66 = arith.constant 2 : index
    %436 = memref.load %arg5[%c2_66] : memref<3xf32, #tpu.memory_space<smem>>
    %437 = vector.broadcast %436 : f32 to vector<8x1xf32>
    %438 = arith.mulf %437, %428 : vector<8x1xf32>
    %439 = arith.addf %435, %438 : vector<8x1xf32>
    %cst_67 = arith.constant 5.000000e-01 : f32
    %440 = vector.broadcast %cst_67 : f32 to vector<8x1xf32>
    %441 = arith.mulf %440, %439 : vector<8x1xf32>
    %442 = math.tanh %441 : vector<8x1xf32>
    %cst_68 = arith.constant 1.000000e+00 : f32
    %443 = vector.broadcast %cst_68 : f32 to vector<8x1xf32>
    %444 = arith.addf %442, %443 : vector<8x1xf32>
    %cst_69 = arith.constant 5.000000e-01 : f32
    %445 = vector.broadcast %cst_69 : f32 to vector<8x1xf32>
    %446 = arith.mulf %445, %444 : vector<8x1xf32>
    %447 = vector.broadcast %446 : vector<8x1xf32> to vector<8x256xf32>
    %448 = arith.mulf %418, %447 : vector<8x256xf32>
    %449 = arith.addf %448, %1 : vector<8x256xf32>
    %c0_70 = arith.constant 0 : index
    %c0_71 = arith.constant 0 : index
    %c0_72 = arith.constant 0 : index
    %450 = vector.load %arg7[%c0_70, %c0_71, %c0_72] : memref<1x8x256xf32, #tpu.memory_space<vmem>>, vector<1x8x256xf32>
    %451 = vector.shape_cast %450 : vector<1x8x256xf32> to vector<8x256xf32>
    %452 = vector.shape_cast %449 : vector<8x256xf32> to vector<1x8x256xf32>
    tpu.vector_store %arg7[%c0_70, %c0_71, %c0_72], %452 {strides = array<i32>} : memref<1x8x256xf32, #tpu.memory_space<vmem>>, vector<1x8x256xf32>,
    return
  }
  func.func @transform_0(%arg0: i32) -> i32 {
    %c0_i32 = arith.constant 0 : i32
    %c0_i32_0 = arith.constant 0 : i32
    return %c0_i32 : i32
  }
  func.func @transform_1(%arg0: i32) -> i32 {
    %c0_i32 = arith.constant 0 : i32
    %c0_i32_0 = arith.constant 0 : i32
    return %c0_i32 : i32
  }
  func.func @transform_2(%arg0: i32) -> i32 {
    %c0_i32 = arith.constant 0 : i32
    %c0_i32_0 = arith.constant 0 : i32
    return %c0_i32 : i32
  }
  func.func @transform_3(%arg0: i32) -> i32 {
    %c0_i32 = arith.constant 0 : i32
    %c0_i32_0 = arith.constant 0 : i32
    return %c0_i32 : i32
  }
  func.func @transform_4(%arg0: i32) -> i32 {
    %c0_i32 = arith.constant 0 : i32
    %c0_i32_0 = arith.constant 0 : i32
    return %c0_i32 : i32
  }
  func.func @transform_5(%arg0: i32) -> (i32, i32, i32) {
    %c0_i32 = arith.constant 0 : i32
    %c0_i32_0 = arith.constant 0 : i32
    %c0_i32_1 = arith.constant 0 : i32
    return %arg0, %c0_i32, %c0_i32_0 : i32, i32, i32
  }
  func.func @transform_6(%arg0: i32) -> (i32, i32, i32) {
    %c0_i32 = arith.constant 0 : i32
    %c0_i32_0 = arith.constant 0 : i32
    %c0_i32_1 = arith.constant 0 : i32
    return %arg0, %c0_i32, %c0_i32_0 : i32, i32, i32
  }
}

</mosaic_0001>

<bundles_post_ra>
// kernel: tpu_custom_call.1
= control target key start
LH: loop header
LB: loop body
LE: loop exit
PB: predicated region body
PF: predicated region fallthrough
CT: control target
= control target key end

     0   :  { %s1948_s0 = inlined_call_operand.hbm [shape: f32[8], index: 0, kind: input, shape index: {}]   ;;  %s1949_s1 = inlined_call_operand.hbm [shape: f32[2], index: 1, kind: input, shape index: {}]   ;;  %s1950_s2 = inlined_call_operand.vmem [shape: f32[72], index: 2, kind: input, shape index: {}]   ;;  %s1951_s3 = inlined_call_operand.vmem [shape: f32[4], index: 3, kind: input, shape index: {}]   ;;  %s1952_s4 = inlined_call_operand.vmem [shape: f32[3], index: 4, kind: input, shape index: {}]   ;;  %s1953_s5 = inlined_call_operand.hbm [shape: f32[1,8,256], index: 5, kind: input, shape index: {}]   ;;  %s1954_s6 = inlined_call_operand.hbm [shape: f32[1,8,256], index: 6, kind: output, shape index: {}]  }
   0x1   :  { %1967 = sst [smem:[#allocation46_spill]] %s1954_s6 }
   0x2   :  { %11 = vsyncpa [#allocation8], 0 }
   0x3   :  { %12 = vsyncpa [#allocation11], 0 }
   0x4   :  { %13 = vsyncpa [#allocation9], 0 }
   0x5   :  { %14 = vsyncpa [#allocation14], 0 }
   0x6   :  { %15 = vsyncpa [#allocation6], 0  ;;  %s49_s23 = sshll.u32 %s1951_s3, 4  ;;  %s50_s23 = int_to_ptr.vmem [resolvable:$true] %s49_s23 }
   0x7   :  { %16 = vsyncpa [#allocation7], 0  ;;  %s22_s26 = sshll.u32 %s1948_s0, 4  ;;  %s1175_s27 = smov [#allocation13]   ;;  %s23_s26 = int_to_ptr.hbm [resolvable:$true] %s22_s26 }
   0x8   :  { %52 = dma.vmem_to_smem %s50_s23, 16, %s1175_s27, [#allocation14]  }
   0x9   :  { %s1176_s28 = smov [#allocation5]   ;;  %s31_s7 = sshll.u32 %s1949_s1, 4  ;;  %s32_s7 = int_to_ptr.hbm [resolvable:$true] %s31_s7 }
   0xa   :  { %25 = dma.hbm_to_smem %s23_s26, 16, %s1176_s28, [#allocation8]  }
   0xb   :  { %s40_s3 = sshll.u32 %s1950_s2, 4  ;;  %s1177_s10 = smov [#allocation10]   ;;  %s41_s3 = int_to_ptr.vmem [resolvable:$true] %s40_s3 }
   0xc   :  { %34 = dma.hbm_to_smem %s32_s7, 16, %s1177_s10, [#allocation11]  }
   0xd   :  { %s1178_s11 = smov [#allocation12]   ;;  %s58_s13 = sshll.u32 %s1952_s4, 4  ;;  %s59_s13 = int_to_ptr.vmem [resolvable:$true] %s58_s13 }
   0xe   :  { %43 = dma.vmem_to_smem %s41_s3, 16, %s1178_s11, [#allocation9]  }
   0xf   :  { %s67_s16 = sshll.u32 %s1953_s5, 4  ;;  %s1179_s1 = smov [#allocation15]   ;;  %s68_s16 = int_to_ptr.hbm [resolvable:$true] %s67_s16 }
  0x10   :  { %61 = dma.vmem_to_smem %s59_s13, 16, %s1179_s1, [#allocation14]  }
  0x11   :  { %s1180_s17 = smov [#allocation16]  }
  0x12   :  { %s69_s18 = sshll.u32 %s1180_s17, 4  ;;  %s70_s18 = int_to_ptr.vmem [resolvable:$true] %s69_s18 }
  0x13   :  { %72 = dma.hbm_to_vmem [thread:$0]  %s68_s16, 256, %s70_s18, [#allocation6]  }
  0x14   :  { %1163 = dma.done.wait [#allocation8], 16  }
  0x15   :  { %1164 = vsyncadd [#allocation8], 4294967280 }
  0x16   :  { %1165 = dma.done.wait [#allocation11], 16  }
  0x17   :  { %1166 = vsyncadd [#allocation11], 4294967280 }
  0x18   :  { %1167 = dma.done.wait [#allocation9], 16  }
  0x19   :  { %1168 = vsyncadd [#allocation9], 4294967280 }
  0x1a   :  { %1169 = dma.done.wait [#allocation14], 32  }
  0x1b   :  { %1170 = vsyncadd [#allocation14], 4294967264 }
  0x1c   :  { %1171 = dma.done.wait [#allocation6], 256  }
  0x1d   :  { %1172 = vsyncadd [#allocation6], 4294967040 }
  0x1e   :  { %97 = sfence }
  0x1f   :  { %s100_s2 = sld [smem:[#allocation5]]  ;;  %v98_v1 = vld [vmem:[#allocation16] sm:$0xff]  ;;  %v99_v3 = vld [vmem:[#allocation16 + $0x8] sm:$0xff]  ;;  %vm147_vm0 = vcmask 1043456   ;;  %s1181_s26 = smov 17  }
  0x20   :  { %s942_s4 = sld [smem:[#allocation5 + $0x1]]  ;;  %s1182_s27 = smov 16  }
  0x21   :  { %s943_s5 = sld [smem:[#allocation5 + $0x2]]  ;;  %s1183_s29 = smov 15  }
  0x22   :  { %s944_s19 = sld [smem:[#allocation5 + $0x3]]  ;;  %s1184_s7 = smov 1  }
  0x23   :  { %s945_s20 = sld [smem:[#allocation5 + $0x4]]  ;;  %s1185_s12 = smov 127  }
  0x24   :  { %s1245_s21 = sld [smem:[#allocation5 + $0x5]]  ;;  %s1186_s13 = smov 113  }
  0x25   :  { %v101_v0 = vstv %s100_s2  ;;  %s947_s22 = sld [smem:[#allocation5 + $0x6]]  ;;  %s1187_s14 = smov 112  }
  0x26   :  { %v105_v2 = vstv %s942_s4  ;;  %v102_v4 = vmul.f32 %v101_v0, %v98_v1  ;;  %s1247_s23 = sld [smem:[#allocation5 + $0x7]]  ;;  %v103_v6 = vmul.f32 %v101_v0, %v99_v3  ;;  %s1188_s15 = smov 111  }
  0x27   :  { %v109_v5 = vstv %s943_s5  ;;  %s1249_s24 = sld [smem:[#allocation10]]  ;;  %v106_v10 = vmul.f32 %v105_v2, %v98_v1  ;;  %v107_v11 = vmul.f32 %v105_v2, %v99_v3 }
  0x28   :  { %v110_v7 = vmul.f32 %v109_v5, %v98_v1  ;;  %v111_v8 = vmul.f32 %v109_v5, %v99_v3  ;;  %v121_v9 = vstv %s944_s19  ;;  %s949_s25 = sld [smem:[#allocation10 + $0x1]] }
  0x29   :  { %v122_v12 = vmul.f32 %v121_v9, %v98_v1  ;;  %v123_v13 = vmul.f32 %v121_v9, %v99_v3  ;;  %v152_v16 = vstv %s945_s20  ;;  %s981_s28 = sld [smem:[#allocation12 + $0x4]] }
  0x2a   :  { %v114_v14 = vrot.slane %v110_v7, 4  ;;  %v115_v15 = vrot.slane %v111_v8, 4  ;;  %v153_v19 = vmul.f32 %v152_v16, %v98_v1  ;;  %v154_v21 = vmul.f32 %v152_v16, %v99_v3  ;;  %s982_s30 = sld [smem:[#allocation12 + $0x16]] }
  0x2b   :  { %v126_v17 = vrot.slane %v122_v12, 4  ;;  %v127_v18 = vrot.slane %v123_v13, 4  ;;  %v156_v22 = vstv %s1245_s21  ;;  %v160_v23 = vstv %s947_s22  ;;  %s983_s8 = sld [smem:[#allocation12 + $0x28]] }
  0x2c   :  { %v118_v20 = vadd.f32 %v114_v14, %v102_v4  ;;  %v119_v24 = vadd.f32 %v115_v15, %v103_v6  ;;  %v157_v27 = vmul.f32 %v156_v22, %v98_v1  ;;  %v158_v28 = vmul.f32 %v156_v22, %v99_v3  ;;  %s984_s9 = sld [smem:[#allocation12 + $0x3a]] }
  0x2d   :  { %v130_v25 = vadd.f32 %v126_v17, %v106_v10  ;;  %v131_v26 = vadd.f32 %v127_v18, %v107_v11  ;;  %v161_v29 = vmul.f32 %v160_v23, %v98_v1  ;;  %v162_v30 = vmul.f32 %v160_v23, %v99_v3  ;;  %s985_s3 = sld [smem:[#allocation12 + $0xd]] }
  0x2e   :  { %v172_v31 = vstv %s1247_s23  ;;  %v141_v36 = vstv %s1249_s24  ;;  %v192_v52 = vstv %s949_s25  ;;  %s986_s10 = sld [smem:[#allocation12 + $0x1f]] }
  0x2f   :  { %v134_v32 = vrot.slane %v130_v25, 2  ;;  %v135_v33 = vrot.slane %v131_v26, 2  ;;  %v173_v34 = vmul.f32 %v172_v31, %v98_v1  ;;  %v174_v35 = vmul.f32 %v172_v31, %v99_v3  ;;  %s987_s11 = sld [smem:[#allocation12 + $0x31]] }
  0x30   :  { %v165_v37 = vrot.slane %v161_v29, 4  ;;  %v166_v38 = vrot.slane %v162_v30, 4  ;;  %v463_v9 = vstv %s981_s28  ;;  %v474_v13 = vstv %s982_s30  ;;  %s988_s0 = sld [smem:[#allocation12 + $0x43]] }
  0x31   :  { %v138_v39 = vadd.f32 %v134_v32, %v118_v20  ;;  %v139_v40 = vadd.f32 %v135_v33, %v119_v24  ;;  %v177_v41 = vrot.slane %v173_v34, 4  ;;  %v178_v42 = vrot.slane %v174_v35, 4  ;;  %s1304_s16 = sld [smem:[#allocation12]] }
  0x32   :  { %v169_v43 = vadd.f32 %v165_v37, %v153_v19  ;;  %v170_v44 = vadd.f32 %v166_v38, %v154_v21  ;;  %v485_v17 = vstv %s983_s8  ;;  %v496_v21 = vstv %s984_s9  ;;  %s1306_s1 = sld [smem:[#allocation12 + $0x12]] }
  0x33   :  { %v142_v45 = vadd.f32 %v141_v36, %v138_v39  ;;  %v143_v46 = vadd.f32 %v141_v36, %v139_v40  ;;  %v181_v47 = vadd.f32 %v177_v41, %v157_v27  ;;  %v182_v48 = vadd.f32 %v178_v42, %v158_v28  ;;  %s1308_s17 = sld [smem:[#allocation12 + $0x24]] }
  0x34   :  { %v507_v25 = vstv %s985_s3  ;;  %v518_v29 = vstv %s986_s10  ;;  %s1310_s18 = sld [smem:[#allocation12 + $0x36]] }
  0x35   :  { %v146_v49 = vrot.slane %v143_v46, 4  ;;  %v185_v50 = vrot.slane %v181_v47, 2  ;;  %v186_v51 = vrot.slane %v182_v48, 2  ;;  %v529_v33 = vstv %s987_s11  ;;  %s1312_s2 = sld [smem:[#allocation12 + $0x9]] }
  0x36   :  { %v540_v37 = vstv %s988_s0  ;;  %s1314_s4 = sld [smem:[#allocation12 + $0x1b]] }
  0x37   :  { %v148_v53 = vsel %vm147_vm0, %v142_v45, %v146_v49  ;;  %v189_v54 = vadd.f32 %v185_v50, %v169_v43  ;;  %v190_v55 = vadd.f32 %v186_v51, %v170_v44  ;;  %s1316_s5 = sld [smem:[#allocation12 + $0x2d]]  ;;  %v208_v51 = vlaneseq }
  0x38   :  { %150 = vst [vmem:[#allocation2] sm:$0x33] %v148_v53  ;;  %s1318_s19 = sld [smem:[#allocation12 + $0x3f]] }
  0x39   :  { %v193_v56 = vadd.f32 %v192_v52, %v189_v54  ;;  %v194_v57 = vadd.f32 %v192_v52, %v190_v55  ;;  %s1320_s20 = sld [smem:[#allocation12 + $0x1]]  ;;  %v1346_v53 = vand.u32 127, %v208_v51 }
  0x3a   :  { %s1322_s21 = sld [smem:[#allocation12 + $0x13]] }
  0x3b   :  { %v197_v58 = vrot.slane %v194_v57, 4  ;;  %s1324_s22 = sld [smem:[#allocation12 + $0x25]]  ;;  %v1357_v54 = vadd.s32 128, %v1346_v53  ;;  %v245_v57 = vstv %s1304_s16  ;;  %vm347_vm2 = vcmp.lt.s32.totalorder %v1346_v53, 15 }
  0x3c   :  { %s1326_s23 = sld [smem:[#allocation12 + $0x37]]  ;;  %vm213_vm3 = vcmp.ge.s32.totalorder %v1346_v53, 16  ;;  %vm239_vm5 = vcmp.lt.s32.totalorder %v1346_v53, 17  ;;  %vm285_vm6 = vcmp.lt.s32.totalorder %v1346_v53, 16  ;;  %vm409_vm11 = vcmp.lt.s32.totalorder %v1346_v53, 1 }
  0x3d   :  { %v198_v59 = vsel %vm147_vm0, %v193_v56, %v197_v58  ;;  %s1328_s24 = sld [smem:[#allocation12 + $0xa]]  ;;  %1985 = vst [vmem:[#allocation41_spill] sm:$0xff] %v1357_v54  ;;  %v211_v56 = vand.u32 15, %v1346_v53  ;;  %v249_v58 = vstv %s1306_s1  ;;  %vm559_vm12 = vcmp.lt.s32.totalorder %v1346_v53, 127 }
  0x3e   :  { %v199_v60 = vrot.slane %v198_v59, 6  ;;  %1984 = sst [smem:[#allocation40_spill]] %s1318_s19  ;;  %v253_v59 = vstv %s1308_s17  ;;  %vm621_vm14 = vcmp.lt.s32.totalorder %v1346_v53, 113  ;;  %vm683_vm0 = vcmp.lt.s32.totalorder %v1346_v53, 112 }
  0x3f   :  { %s1330_s25 = sld [smem:[#allocation12 + $0x1c]]  ;;  %vm1379_vm1 = vcmp.lt.s32.totalorder %v211_v56, 15  ;;  %vm1387_vm4 = vcmp.ge.s32.totalorder %v211_v56, 1 }
  0x40   :  { %201 = vst [vmem:[#allocation2] sm:$0xcc] %v199_v60  ;;  %s1336_s28 = sld [smem:[#allocation12 + $0x2]]  ;;  %v212_v60 = vand.u32 15, %v1357_v54  ;;  %vm223_vm8 = vmand %vm213_vm3, %vm1379_vm1 }
  0x41   :  { %s1340_s30 = sld [smem:[#allocation12 + $0x26]]  ;;  %vm221_vm10 = vmand %vm213_vm3, %vm1387_vm4 }
  0x42   :  { %s1344_s8 = sld [smem:[#allocation12 + $0xb]]  ;;  %vm1402_vm7 = vcmp.ge.s32.totalorder %v212_v60, 1  ;;  %vm1415_vm9 = vcmp.lt.s32.totalorder %v212_v60, 15 }
  0x43   :  { %s1348_s9 = sld [smem:[#allocation12 + $0x1d]] }
  0x44   :  { %s1350_s3 = sld [smem:[#allocation12 + $0x2f]] }
  0x45   :  { %s1352_s10 = sld [smem:[#allocation12 + $0x41]] }
  0x46   :  { %s1354_s11 = sld [smem:[#allocation12 + $0x3]] }
  0x47   :  { %v202_v61 = vld [vmem:[#allocation2] sm:$0xff]  ;;  %s1359_s0 = sld [smem:[#allocation12 + $0x15]] }
  0x48   :  { %v203_v62 = vmul.f32 0.5, %v202_v61  ;;  %s1384_s6 = sld [smem:[#allocation12 + $0x30]] }
  0x49   :  { %s1512_s1 = sld [smem:[#allocation12 + $0x3b]] }
  0x4a   :  { %1045 = vtanh.f32 %v203_v62  ;;  %v261_v62 = vstv %s1312_s2  ;;  %s1522_s17 = sld [smem:[#allocation12 + $0xe]] }
  0x4b   :  { %s1542_s2 = sld [smem:[#allocation12 + $0x32]] }
  0x4c   :  { %s1654_s16 = sld [smem:[#allocation12 + $0x34]] }
  0x50   :  { %v1046_v63 = vpop.eup %1045 }
  0x51   :  { %v205_v0 = vadd.f32 1.0, %v1046_v63  ;;  %v265_v63 = vstv %s1314_s4  ;;  %s1552_s4 = sld [smem:[#allocation12 + $0x44]] }
  0x53   :  { %v206_v1 = vmul.f32 0.5, %v205_v0  ;;  %v269_v0 = vstv %s1316_s5  ;;  %s1562_s5 = sld [smem:[#allocation12 + $0x6]] }
  0x55   :  { %v1254_v2 = vmul.f32 %v206_v1, %v202_v61  ;;  %v257_v61 = vstv %s1310_s18  ;;  %v273_v1 = vstv %s1318_s19  ;;  %s1393_s19 = sld [smem:[#allocation12 + $0x42]] }
  0x56   :  { %s1532_s18 = sld [smem:[#allocation12 + $0x20]] }
  0x57   :  { %230 = vst [vmem:[#allocation1] ss:$2 sm:$0xff] %v1254_v2  ;;  %v464_v10 = vmul.f32 %v463_v9, %v1254_v2  ;;  %v475_v14 = vmul.f32 %v474_v13, %v1254_v2  ;;  %v486_v18 = vmul.f32 %v485_v17, %v1254_v2  ;;  %v497_v22 = vmul.f32 %v496_v21, %v1254_v2 }
  0x58   :  { %v508_v26 = vmul.f32 %v507_v25, %v1254_v2  ;;  %v519_v30 = vmul.f32 %v518_v29, %v1254_v2  ;;  %v530_v34 = vmul.f32 %v529_v33, %v1254_v2  ;;  %v541_v38 = vmul.f32 %v540_v37, %v1254_v2 }
  0x59   :  { %v353_v21 = vstv %s1336_s28  ;;  %v383_v33 = vstv %s1348_s9  ;;  %v395_v37 = vstv %s1352_s10  ;;  %s1480_s28 = sld [smem:[#allocation12 + $0x5]] }
  0x5a   :  { %s1624_s9 = sld [smem:[#allocation12 + $0x3d]] }
  0x5b   :  { %s1644_s10 = sld [smem:[#allocation12 + $0x22]] }
  0x5e   :  { %v231_v3 = vld.sshfl [vmem:[#allocation1] sm:$0xff pattern:$0x75316420]  ;;  %v232_v4 = vld.sshfl [vmem:[#allocation1 + $0x8] sm:$0xff pattern:$0x75316420] }
  0x5f   :  { %235 = vrot.lane.b32.xlu0 %v231_v3, %s1181_s26  ;;  %276 = vst [vmem:[#allocation1] ss:$2 sm:$0xff] %v1254_v2 }
  0x66   :  { %v277_v5 = vld.sshfl [vmem:[#allocation1] sm:$0xff pattern:$0x75316420]  ;;  %v278_v6 = vld.sshfl [vmem:[#allocation1 + $0x8] sm:$0xff pattern:$0x75316420] }
  0x67   :  { %281 = vrot.lane.b32.xlu1 %v277_v5, %s1182_s27  ;;  %237 = vrot.lane.b32.xlu0 %v232_v4, %s1181_s26  ;;  %338 = vst [vmem:[#allocation1] ss:$2 sm:$0xff] %v1254_v2  ;;  %s1332_s26 = sld [smem:[#allocation12 + $0x2e]]  ;;  %v1989_v4 = vmov 0  ;;  %v291_v5 = vstv %s1320_s20 }
  0x68   :  { %v1990_v4 = vsel %vm1387_vm4, 4294967295, %v1989_v4  ;;  %s1570_s20 = sld [smem:[#allocation12 + $0x18]] }
  0x69   :  { %1991 = vst [vmem:[#allocation43_spill] sm:$0xff] %v1990_v4 }
  0x6e   :  { %v339_v7 = vld.sshfl [vmem:[#allocation1] sm:$0xff pattern:$0x75316420]  ;;  %v340_v8 = vld.sshfl [vmem:[#allocation1 + $0x8] sm:$0xff pattern:$0x75316420] }
  0x6f   :  { %283 = vrot.lane.b32.xlu1 %v278_v6, %s1182_s27  ;;  %400 = vst [vmem:[#allocation1] ss:$2 sm:$0xff] %v1254_v2  ;;  %343 = vrot.lane.b32.xlu2 %v339_v7, %s1183_s29  ;;  %s1334_s27 = sld [smem:[#allocation12 + $0x40]]  ;;  %v297_v7 = vstv %s1322_s21 }
  0x70   :  { %s1574_s21 = sld [smem:[#allocation12 + $0x2a]] }
  0x76   :  { %v402_v11 = vld.sshfl [vmem:[#allocation1 + $0x8] sm:$0xff pattern:$0x75316420]  ;;  %v401_v12 = vld.sshfl [vmem:[#allocation1] sm:$0xff pattern:$0x75316420] }
  0x77   :  { %407 = vrot.lane.b32.xlu1 %v402_v11, %s1184_s7  ;;  %405 = vrot.lane.b32.xlu0 %v401_v12, %s1184_s7  ;;  %466 = vst [vmem:[#allocation1] ss:$2 sm:$0xff] %v464_v10  ;;  %s1342_s7 = sld [smem:[#allocation12 + $0x38]] }
  0x78   :  { %345 = vrot.lane.b32.xlu2 %v340_v8, %s1183_s29  ;;  %s1338_s29 = sld [smem:[#allocation12 + $0x14]] }
  0x7d   :  { %v371_v29 = vstv %s1342_s7  ;;  %s1607_s7 = sld [smem:[#allocation12 + $0x19]] }
  0x7e   :  { %v1262_v15 = vld.sshfl [vmem:[#allocation1] sm:$0xff pattern:$0x75316420]  ;;  %v1264_v16 = vld.sshfl [vmem:[#allocation1 + $0x8] sm:$0xff pattern:$0x75316420]  ;;  %v359_v25 = vstv %s1338_s29 }
  0x7f   :  { %1968 = vst [vmem:[#allocation24_spill] sm:$0xff] %v1262_v15  ;;  %s1490_s29 = sld [smem:[#allocation12 + $0x17]] }
  0x80   :  { %1969 = vst [vmem:[#allocation25_spill] sm:$0xff] %v1264_v16 }
  0x81   :  { %477 = vst [vmem:[#allocation1] ss:$2 sm:$0xff] %v475_v14 }
  0x88   :  { %v1267_v19 = vld.sshfl [vmem:[#allocation1] sm:$0xff pattern:$0x75316420]  ;;  %v1269_v20 = vld.sshfl [vmem:[#allocation1 + $0x8] sm:$0xff pattern:$0x75316420] }
  0x89   :  { %1970 = vst [vmem:[#allocation26_spill] sm:$0xff] %v1267_v19  ;;  %v2004_v19 = vstv %s1330_s25  ;;  %s1587_s25 = sld [smem:[#allocation12 + $0x33]] }
  0x8a   :  { %1971 = vst [vmem:[#allocation27_spill] sm:$0xff] %v1269_v20 }
  0x8b   :  { %488 = vst [vmem:[#allocation1] ss:$2 sm:$0xff] %v486_v18  ;;  %v1994_v18 = vmov 0 }
  0x8c   :  { %v1995_v18 = vsel %vm1415_vm9, 4294967295, %v1994_v18 }
  0x8d   :  { %1996 = vst [vmem:[#allocation44_spill] sm:$0xff] %v1995_v18 }
  0x92   :  { %v1272_v23 = vld.sshfl [vmem:[#allocation1] sm:$0xff pattern:$0x75316420]  ;;  %v1274_v24 = vld.sshfl [vmem:[#allocation1 + $0x8] sm:$0xff pattern:$0x75316420] }
  0x93   :  { %1972 = vst [vmem:[#allocation28_spill] sm:$0xff] %v1272_v23 }
  0x94   :  { %1973 = vst [vmem:[#allocation29_spill] sm:$0xff] %v1274_v24 }
  0x95   :  { %499 = vst [vmem:[#allocation1] ss:$2 sm:$0xff] %v497_v22 }
  0x9c   :  { %v1277_v27 = vld.sshfl [vmem:[#allocation1] sm:$0xff pattern:$0x75316420]  ;;  %v1279_v28 = vld.sshfl [vmem:[#allocation1 + $0x8] sm:$0xff pattern:$0x75316420] }
  0x9d   :  { %1974 = vst [vmem:[#allocation30_spill] sm:$0xff] %v1277_v27 }
  0x9e   :  { %1975 = vst [vmem:[#allocation31_spill] sm:$0xff] %v1279_v28 }
  0x9f   :  { %510 = vst [vmem:[#allocation1] ss:$2 sm:$0xff] %v508_v26  ;;  %v365_v26 = vstv %s1340_s30  ;;  %s1502_s30 = sld [smem:[#allocation12 + $0x29]] }
  0xa6   :  { %v1282_v31 = vld.sshfl [vmem:[#allocation1] sm:$0xff pattern:$0x75316420]  ;;  %v1284_v32 = vld.sshfl [vmem:[#allocation1 + $0x8] sm:$0xff pattern:$0x75316420] }
  0xa7   :  { %1976 = vst [vmem:[#allocation32_spill] sm:$0xff] %v1282_v31 }
  0xa8   :  { %1977 = vst [vmem:[#allocation33_spill] sm:$0xff] %v1284_v32  ;;  %v2008_v32 = vstv %s1334_s27  ;;  %s1601_s27 = sld [smem:[#allocation12 + $0x7]] }
  0xa9   :  { %521 = vst [vmem:[#allocation1] ss:$2 sm:$0xff] %v519_v30  ;;  %v377_v30 = vstv %s1344_s8  ;;  %v2009_v20 = vmov %v2008_v32  ;;  %s1614_s8 = sld [smem:[#allocation12 + $0x2b]] }
  0xb0   :  { %v1287_v35 = vld.sshfl [vmem:[#allocation1] sm:$0xff pattern:$0x75316420]  ;;  %v1289_v36 = vld.sshfl [vmem:[#allocation1 + $0x8] sm:$0xff pattern:$0x75316420] }
  0xb1   :  { %1978 = vst [vmem:[#allocation34_spill] sm:$0xff] %v1287_v35 }
  0xb2   :  { %1979 = vst [vmem:[#allocation35_spill] sm:$0xff] %v1289_v36 }
  0xb3   :  { %532 = vst [vmem:[#allocation1] ss:$2 sm:$0xff] %v530_v34  ;;  %v389_v34 = vstv %s1350_s3  ;;  %s1634_s3 = sld [smem:[#allocation12 + $0x10]] }
  0xba   :  { %v1292_v39 = vld.sshfl [vmem:[#allocation1] sm:$0xff pattern:$0x75316420]  ;;  %v1294_v40 = vld.sshfl [vmem:[#allocation1 + $0x8] sm:$0xff pattern:$0x75316420] }
  0xbb   :  { %1980 = vst [vmem:[#allocation36_spill] sm:$0xff] %v1292_v39  ;;  %v2000_v39 = vstv %s1326_s23  ;;  %s1578_s23 = sld [smem:[#allocation12 + $0xf]] }
  0xbc   :  { %1981 = vst [vmem:[#allocation37_spill] sm:$0xff] %v1294_v40  ;;  %v2001_v31 = vmov %v2000_v39  ;;  %v2006_v40 = vstv %s1332_s26  ;;  %s1594_s26 = sld [smem:[#allocation12 + $0x45]] }
  0xbd   :  { %543 = vst [vmem:[#allocation1] ss:$2 sm:$0xff] %v541_v38  ;;  %v2007_v36 = vmov %v2006_v40 }
  0xc4   :  { %v1296_v41 = vld.sshfl [vmem:[#allocation1] sm:$0xff pattern:$0x75316420]  ;;  %v1298_v42 = vld.sshfl [vmem:[#allocation1 + $0x8] sm:$0xff pattern:$0x75316420] }
  0xc5   :  { %1982 = vst [vmem:[#allocation38_spill] sm:$0xff] %v1296_v41 }
  0xc6   :  { %1983 = vst [vmem:[#allocation39_spill] sm:$0xff] %v1298_v42 }
  0xc7   :  { %550 = vst [vmem:[#allocation1] ss:$2 sm:$0xff] %v1254_v2 }
  0xc9   :  { %v344_v52 = vpop.permute.xlu2 %343 }
  0xce   :  { %v552_v43 = vld.sshfl [vmem:[#allocation1 + $0x8] sm:$0xff pattern:$0x75316420]  ;;  %v551_v44 = vld.sshfl [vmem:[#allocation1] sm:$0xff pattern:$0x75316420] }
  0xcf   :  { %557 = vrot.lane.b32.xlu0 %v552_v43, %s1185_s12  ;;  %612 = vst [vmem:[#allocation1] ss:$2 sm:$0xff] %v1254_v2  ;;  %555 = vrot.lane.b32.xlu2 %v551_v44, %s1185_s12  ;;  %s1361_s12 = sld [smem:[#allocation12 + $0x27]] }
  0xd1   :  { %v236_v55 = vpop.permute.xlu0 %235 }
  0xd2   :  { %v346_v3 = vpop.permute.xlu2 %345 }
  0xd3   :  { %v349_v14 = vsel %vm347_vm2, %v346_v3, %v344_v52  ;;  %v348_v22 = vsel %vm347_vm2, %v344_v52, %v346_v3  ;;  %vm745_vm2 = vcmp.lt.s32.totalorder %v1346_v53, 111 }
  0xd4   :  { %v350_v38 = vsel %vm223_vm8, %v349_v14, 0.0  ;;  %v351_v44 = vsel %vm1415_vm9, %v348_v22, 0.0 }
  0xd5   :  { %v1444_v52 = vmul.f32 %v353_v21, %v350_v38  ;;  %v1449_v14 = vmul.f32 %v353_v21, %v351_v44  ;;  %v1451_v22 = vmul.f32 %v359_v25, %v350_v38  ;;  %v1461_v51 = vmul.f32 %v371_v29, %v350_v38 }
  0xd6   :  { %v613_v45 = vld.sshfl [vmem:[#allocation1] sm:$0xff pattern:$0x75316420]  ;;  %v614_v46 = vld.sshfl [vmem:[#allocation1 + $0x8] sm:$0xff pattern:$0x75316420]  ;;  %v1463_v21 = vmul.f32 %v371_v29, %v351_v44  ;;  %v1467_v60 = vmul.f32 %v377_v30, %v351_v44  ;;  %v1469_v56 = vmul.f32 %v383_v33, %v350_v38  ;;  %v1478_v29 = vmul.f32 %v389_v34, %v351_v44 }
  0xd7   :  { %617 = vrot.lane.b32.xlu1 %v613_v45, %s1186_s13  ;;  %674 = vst [vmem:[#allocation1] ss:$2 sm:$0xff] %v1254_v2  ;;  %619 = vrot.lane.b32.xlu2 %v614_v46, %s1186_s13  ;;  %s1364_s13 = sld [smem:[#allocation12 + $0x39]]  ;;  %v1455_v46 = vmul.f32 %v365_v26, %v350_v38  ;;  %v1486_v17 = vmul.f32 %v395_v37, %v350_v38 }
  0xd8   :  { %v1488_v13 = vmul.f32 %v395_v37, %v351_v44 }
  0xd9   :  { %v1395_v6 = vpop.permute.xlu1 %281  ;;  %v238_v43 = vpop.permute.xlu0 %237 }
  0xde   :  { %v676_v47 = vld.sshfl [vmem:[#allocation1 + $0x8] sm:$0xff pattern:$0x75316420]  ;;  %v675_v48 = vld.sshfl [vmem:[#allocation1] sm:$0xff pattern:$0x75316420] }
  0xdf   :  { %681 = vrot.lane.b32.xlu1 %v676_v47, %s1187_s14  ;;  %679 = vrot.lane.b32.xlu0 %v675_v48, %s1187_s14  ;;  %736 = vst [vmem:[#allocation1] ss:$2 sm:$0xff] %v1254_v2  ;;  %s1369_s14 = sld [smem:[#allocation12 + $0xc]]  ;;  %v1986_v2 = vmov 0  ;;  %v240_v48 = vsel %vm239_vm5, %v236_v55, %v238_v43  ;;  %v1453_v47 = vmul.f32 %v359_v25, %v351_v44 }
  0xe0   :  { %v1987_v2 = vsel %vm1379_vm1, 4294967295, %v1986_v2  ;;  %v1465_v25 = vmul.f32 %v377_v30, %v350_v38 }
  0xe1   :  { %1988 = vst [vmem:[#allocation42_spill] sm:$0xff] %v1987_v2  ;;  %v284_v3 = vpop.permute.xlu1 %283 }
  0xe6   :  { %v738_v49 = vld.sshfl [vmem:[#allocation1 + $0x8] sm:$0xff pattern:$0x75316420]  ;;  %v737_v50 = vld.sshfl [vmem:[#allocation1] sm:$0xff pattern:$0x75316420] }
  0xe7   :  { %743 = vrot.lane.b32.xlu0 %v738_v49, %s1188_s15  ;;  %741 = vrot.lane.b32.xlu2 %v737_v50, %s1188_s15  ;;  %s1375_s15 = sld [smem:[#allocation12 + $0x1e]]  ;;  %v241_v49 = vsel %vm239_vm5, %v238_v43, %v236_v55  ;;  %v243_v55 = vsel %vm1402_vm7, %v240_v48, 0.0  ;;  %v1459_v43 = vmul.f32 %v365_v26, %v351_v44  ;;  %v287_v48 = vsel %vm285_vm6, %v284_v3, %v1395_v6 }
  0xe8   :  { %v242_v45 = vsel %vm221_vm10, %v241_v49, 0.0  ;;  %v1474_v26 = vmul.f32 %v383_v33, %v351_v44  ;;  %v1476_v49 = vmul.f32 %v389_v34, %v350_v38  ;;  %v247_v50 = vmul.f32 %v245_v57, %v243_v55 }
  0xe9   :  { %v246_v30 = vmul.f32 %v245_v57, %v242_v45  ;;  %v250_v33 = vmul.f32 %v249_v58, %v242_v45  ;;  %v251_v34 = vmul.f32 %v249_v58, %v243_v55  ;;  %v254_v12 = vmul.f32 %v253_v59, %v242_v45  ;;  %v408_v16 = vpop.permute.xlu1 %407 }
  0xea   :  { %v286_v57 = vsel %vm285_vm6, %v1395_v6, %v284_v3  ;;  %v255_v37 = vmul.f32 %v253_v59, %v243_v55  ;;  %v258_v38 = vmul.f32 %v257_v61, %v242_v45  ;;  %v259_v58 = vmul.f32 %v257_v61, %v243_v55 }
  0xeb   :  { %v288_v44 = vsel %vm213_vm3, %v287_v48, 0.0  ;;  %v262_v6 = vmul.f32 %v261_v62, %v242_v45  ;;  %v263_v3 = vmul.f32 %v261_v62, %v243_v55  ;;  %v266_v59 = vmul.f32 %v265_v63, %v242_v45 }
  0xec   :  { %v267_v10 = vmul.f32 %v265_v63, %v243_v55  ;;  %v270_v61 = vmul.f32 %v269_v0, %v242_v45  ;;  %v271_v48 = vmul.f32 %v269_v0, %v243_v55  ;;  %v274_v9 = vmul.f32 %v273_v1, %v242_v45 }
  0xed   :  { %v293_v62 = vmul.f32 %v291_v5, %v286_v57  ;;  %v275_v8 = vmul.f32 %v273_v1, %v243_v55  ;;  %v292_v63 = vmul.f32 %v291_v5, %v288_v44  ;;  %v298_v18 = vmul.f32 %v297_v7, %v288_v44 }
  0xee   :  { %v299_v2 = vmul.f32 %v297_v7, %v286_v57  ;;  %v1998_v0 = vstv %s1324_s22  ;;  %v310_v35 = vmul.f32 %v2000_v39, %v288_v44  ;;  %v311_v1 = vmul.f32 %v2001_v31, %v286_v57  ;;  %s1576_s22 = sld [smem:[#allocation12 + $0x3c]] }
  0xef   :  { %v304_v45 = vmul.f32 %v1998_v0, %v288_v44  ;;  %v1999_v54 = vmov %v1998_v0  ;;  %v2002_v5 = vstv %s1328_s24  ;;  %v322_v15 = vmul.f32 %v2004_v19, %v288_v44  ;;  %s1582_s24 = sld [smem:[#allocation12 + $0x21]] }
  0xf0   :  { %v305_v41 = vmul.f32 %v1999_v54, %v286_v57  ;;  %v316_v55 = vmul.f32 %v2002_v5, %v288_v44  ;;  %v2003_v27 = vmov %v2002_v5  ;;  %v2005_v7 = vmov %v2004_v19  ;;  %v406_v19 = vpop.permute.xlu0 %405 }
  0xf1   :  { %v317_v23 = vmul.f32 %v2003_v27, %v286_v57  ;;  %v323_v42 = vmul.f32 %v2005_v7, %v286_v57  ;;  %v295_v0 = vadd.f32 %v293_v62, %v247_v50  ;;  %v328_v54 = vmul.f32 %v2006_v40, %v288_v44 }
  0xf2   :  { %v329_v39 = vmul.f32 %v2007_v36, %v286_v57  ;;  %v334_v28 = vmul.f32 %v2008_v32, %v288_v44  ;;  %v294_v31 = vadd.f32 %v292_v63, %v246_v30  ;;  %v300_v24 = vadd.f32 %v298_v18, %v250_v33 }
  0xf3   :  { %v301_v5 = vadd.f32 %v299_v2, %v251_v34  ;;  %v335_v27 = vmul.f32 %v2009_v20, %v286_v57  ;;  %v306_v7 = vadd.f32 %v304_v45, %v254_v12  ;;  %v307_v4 = vadd.f32 %v305_v41, %v255_v37 }
  0xf4   :  { %v312_v50 = vadd.f32 %v310_v35, %v258_v38  ;;  %v313_v62 = vadd.f32 %v311_v1, %v259_v58  ;;  %v318_v36 = vadd.f32 %v316_v55, %v262_v6  ;;  %v319_v40 = vadd.f32 %v317_v23, %v263_v3 }
  0xf5   :  { %v324_v32 = vadd.f32 %v322_v15, %v266_v59  ;;  %v325_v44 = vadd.f32 %v323_v42, %v267_v10  ;;  %v330_v18 = vadd.f32 %v328_v54, %v270_v61  ;;  %v331_v2 = vadd.f32 %v329_v39, %v271_v48 }
  0xf6   :  { %v336_v30 = vadd.f32 %v334_v28, %v274_v9  ;;  %v410_v20 = vsel %vm409_vm11, %v406_v19, %v408_v16  ;;  %v337_v12 = vadd.f32 %v335_v27, %v275_v8  ;;  %v356_v35 = vadd.f32 %v1444_v52, %v294_v31 }
  0xf7   :  { %v357_v41 = vadd.f32 %v1449_v14, %v295_v0  ;;  %v362_v33 = vadd.f32 %v1451_v22, %v300_v24  ;;  %v363_v15 = vadd.f32 %v1453_v47, %v301_v5  ;;  %v368_v23 = vadd.f32 %v1455_v46, %v306_v7 }
  0xf8   :  { %v369_v28 = vadd.f32 %v1459_v43, %v307_v4  ;;  %v411_v42 = vsel %vm409_vm11, %v408_v16, %v406_v19  ;;  %v374_v8 = vadd.f32 %v1461_v51, %v312_v50  ;;  %v375_v9 = vadd.f32 %v1463_v21, %v313_v62 }
  0xf9   :  { %v380_v24 = vadd.f32 %v1465_v25, %v318_v36  ;;  %v413_v10 = vsel %vm1402_vm7, %v410_v20, 0.0  ;;  %v381_v16 = vadd.f32 %v1467_v60, %v319_v40  ;;  %v386_v4 = vadd.f32 %v1469_v56, %v324_v32 }
  0xfa   :  { %v387_v46 = vadd.f32 %v1474_v26, %v325_v44  ;;  %v392_v47 = vadd.f32 %v1476_v49, %v330_v18  ;;  %v393_v51 = vadd.f32 %v1478_v29, %v331_v2  ;;  %v398_v52 = vadd.f32 %v1486_v17, %v336_v30 }
  0xfb   :  { %v399_v60 = vadd.f32 %v1488_v13, %v337_v12  ;;  %v412_v56 = vsel %vm1387_vm4, %v411_v42, 0.0  ;;  %v2011_v22 = vstv %s1354_s11  ;;  %v2012_v21 = vstv %s1359_s0  ;;  %s1656_s11 = sld [smem:[#allocation12 + $0x46]] }
  0xfc   :  { %v417_v43 = vmul.f32 %v2011_v22, %v413_v10  ;;  %v423_v25 = vmul.f32 %v2012_v21, %v413_v10  ;;  %v2013_v26 = vstv %s1361_s12  ;;  %v2014_v29 = vstv %s1364_s13  ;;  %s1658_s0 = sld [smem:[#allocation12 + $0x8]] }
  0xfd   :  { %v429_v49 = vmul.f32 %v2013_v26, %v413_v10  ;;  %v435_v17 = vmul.f32 %v2014_v29, %v413_v10  ;;  %v2015_v13 = vstv %s1369_s14  ;;  %v2016_v57 = vstv %s1375_s15  ;;  %s1676_s12 = sld [smem:[#allocation12 + $0x3e]] }
  0xfe   :  { %v441_v34 = vmul.f32 %v2015_v13, %v413_v10  ;;  %v447_v37 = vmul.f32 %v2016_v57, %v413_v10  ;;  %v2017_v38 = vstv %s1384_s6  ;;  %v2018_v6 = vstv %s1393_s19  ;;  %s1660_s6 = sld [smem:[#allocation12 + $0x1a]] }
  0xff   :  { %v453_v58 = vmul.f32 %v2017_v38, %v413_v10  ;;  %v459_v3 = vmul.f32 %v2018_v6, %v413_v10  ;;  %v2019_v59 = vmov %v2011_v22  ;;  %v2020_v48 = vmov %v2012_v21  ;;  %s1662_s19 = sld [smem:[#allocation12 + $0x2c]] }
 0x100   :  { %v416_v61 = vmul.f32 %v2019_v59, %v412_v56  ;;  %v422_v63 = vmul.f32 %v2020_v48, %v412_v56  ;;  %v2021_v45 = vmov %v2013_v26  ;;  %v2022_v55 = vmov %v2014_v29  ;;  %s1690_s13 = sld [smem:[#allocation12 + $0x11]] }
 0x101   :  { %v428_v1 = vmul.f32 %v2021_v45, %v412_v56  ;;  %v434_v0 = vmul.f32 %v2022_v55, %v412_v56  ;;  %v2023_v54 = vmov %v2015_v13  ;;  %v2024_v31 = vmov %v2016_v57  ;;  %s1704_s14 = sld [smem:[#allocation12 + $0x23]] }
 0x102   :  { %v440_v39 = vmul.f32 %v2023_v54, %v412_v56  ;;  %v446_v5 = vmul.f32 %v2024_v31, %v412_v56  ;;  %v2025_v27 = vmov %v2017_v38  ;;  %v2026_v7 = vmov %v2018_v6  ;;  %s1718_s15 = sld [smem:[#allocation12 + $0x35]] }
 0x103   :  { %v452_v19 = vmul.f32 %v2025_v27, %v412_v56  ;;  %v458_v50 = vmul.f32 %v2026_v7, %v412_v56  ;;  %v419_v62 = vadd.f32 %v417_v43, %v357_v41  ;;  %v425_v36 = vadd.f32 %v423_v25, %v363_v15  ;;  %v2034_v43 = vld [vmem:[#allocation39_spill] sm:$0xff]  ;;  %v2036_v25 = vld [vmem:[#allocation24_spill] sm:$0xff] }
 0x104   :  { %v431_v40 = vadd.f32 %v429_v49, %v369_v28  ;;  %v437_v32 = vadd.f32 %v435_v17, %v375_v9  ;;  %v443_v44 = vadd.f32 %v441_v34, %v381_v16  ;;  %v449_v18 = vadd.f32 %v447_v37, %v387_v46  ;;  %v2027_v28 = vld [vmem:[#allocation25_spill] sm:$0xff]  ;;  %v2028_v16 = vld [vmem:[#allocation27_spill] sm:$0xff]  ;;  %v2037_v49 = vld [vmem:[#allocation26_spill] sm:$0xff] }
 0x105   :  { %v455_v2 = vadd.f32 %v453_v58, %v393_v51  ;;  %v461_v30 = vadd.f32 %v459_v3, %v399_v60  ;;  %v418_v20 = vadd.f32 %v416_v61, %v356_v35  ;;  %v424_v12 = vadd.f32 %v422_v63, %v362_v33  ;;  %v2029_v51 = vld [vmem:[#allocation29_spill] sm:$0xff]  ;;  %v2030_v35 = vld [vmem:[#allocation31_spill] sm:$0xff]  ;;  %v2038_v17 = vld [vmem:[#allocation28_spill] sm:$0xff] }
 0x106   :  { %v430_v42 = vadd.f32 %v428_v1, %v368_v23  ;;  %v436_v10 = vadd.f32 %v434_v0, %v374_v8  ;;  %v442_v56 = vadd.f32 %v440_v39, %v380_v24  ;;  %v448_v22 = vadd.f32 %v446_v5, %v386_v4  ;;  %v2031_v23 = vld [vmem:[#allocation33_spill] sm:$0xff]  ;;  %v2032_v24 = vld [vmem:[#allocation35_spill] sm:$0xff]  ;;  %2035 = sst [smem:[#allocation40_spill]] %s1690_s13  ;;  %v2039_v34 = vld [vmem:[#allocation30_spill] sm:$0xff] }
 0x107   :  { %v454_v41 = vadd.f32 %v452_v19, %v392_v47  ;;  %v460_v15 = vadd.f32 %v458_v50, %v398_v52  ;;  %v1665_v9 = vadd.f32 %v2027_v28, %v419_v62  ;;  %v1668_v46 = vadd.f32 %v2028_v16, %v425_v36  ;;  %v2033_v47 = vld [vmem:[#allocation37_spill] sm:$0xff]  ;;  %2040 = sst [smem:[#allocation45_spill]] %s1704_s14  ;;  %v2041_v37 = vld [vmem:[#allocation32_spill] sm:$0xff]  ;;  %v2042_v58 = vld [vmem:[#allocation34_spill] sm:$0xff] }
 0x108   :  { %v1671_v60 = vadd.f32 %v2029_v51, %v431_v40  ;;  %v1674_v33 = vadd.f32 %v2030_v35, %v437_v32  ;;  %v1679_v8 = vadd.f32 %v2031_v23, %v443_v44  ;;  %v1682_v4 = vadd.f32 %v2032_v24, %v449_v18  ;;  %v2043_v3 = vld [vmem:[#allocation36_spill] sm:$0xff]  ;;  %v2044_v61 = vld [vmem:[#allocation38_spill] sm:$0xff]  ;;  %s1724_s14 = sld [smem:[#allocation12 + $0x47]] }
 0x109   :  { %v1685_v52 = vadd.f32 %v2033_v47, %v455_v2  ;;  %v1688_v21 = vadd.f32 %v2034_v43, %v461_v30  ;;  %v1693_v26 = vadd.f32 %v2036_v25, %v418_v20  ;;  %v1696_v29 = vadd.f32 %v2037_v49, %v424_v12  ;;  %s1730_s13 = sld [smem:[#allocation13]]  ;;  %v2045_v50 = vld [vmem:[#allocation41_spill] sm:$0xff] }
 0x10a   :  { %v1699_v13 = vadd.f32 %v2038_v17, %v430_v42  ;;  %v1702_v57 = vadd.f32 %v2039_v34, %v436_v10  ;;  %v1707_v38 = vadd.f32 %v2041_v37, %v442_v56  ;;  %v1710_v6 = vadd.f32 %v2042_v58, %v448_v22 }
 0x10b   :  { %v1713_v59 = vadd.f32 %v2043_v3, %v454_v41  ;;  %v1716_v48 = vadd.f32 %v2044_v61, %v460_v15  ;;  %v565_v63 = vstv %s1480_s28  ;;  %v571_v45 = vstv %s1490_s29  ;;  %s1736_s28 = sld [smem:[#allocation13 + $0x1]] }
 0x10c   :  { %v577_v1 = vstv %s1502_s30  ;;  %v583_v55 = vstv %s1512_s1  ;;  %v589_v0 = vstv %s1522_s17  ;;  %v595_v54 = vstv %s1532_s18  ;;  %s1743_s29 = sld [smem:[#allocation13 + $0x2]] }
 0x10d   :  { %v601_v39 = vstv %s1542_s2  ;;  %v607_v31 = vstv %s1552_s4  ;;  %v627_v5 = vstv %s1562_s5  ;;  %v633_v27 = vstv %s1570_s20  ;;  %s1749_s30 = sld [smem:[#allocation13 + $0x3]]  ;;  %s1191_s5 = smov [#allocation17]  }
 0x10e   :  { %v639_v19 = vstv %s1574_s21  ;;  %vm216_vm13 = vcmp.lt.s32.totalorder %v2045_v50, 240  ;;  %v645_v62 = vstv %s1576_s22  ;;  %v651_v36 = vstv %s1578_s23  ;;  %s2046_s1 = sld [smem:[#allocation40_spill]]  ;;  %s926_s20 = sshll.u32 %s1191_s5, 4  ;;  %s927_s20 = int_to_ptr.vmem [resolvable:$true] %s926_s20 }
 0x10f   :  { %v657_v40 = vstv %s1582_s24  ;;  %v663_v32 = vstv %s1587_s25  ;;  %v669_v44 = vstv %s1594_s26  ;;  %v689_v18 = vstv %s1601_s27  ;;  %s2047_s17 = sld [smem:[#allocation45_spill]]  ;;  %vm226_vm15 = vmand %vm216_vm13, %vm1402_vm7 }
 0x110   :  { %v695_v2 = vstv %s1607_s7  ;;  %v701_v30 = vstv %s1614_s8  ;;  %v707_v12 = vstv %s1624_s9  ;;  %v713_v42 = vstv %s1634_s3  ;;  %vm228_vm3 = vmand %vm216_vm13, %vm1415_vm9  ;;  %s895_s18 = sld [smem:[#allocation15]] }
 0x111   :  { %v719_v10 = vstv %s1644_s10  ;;  %v725_v56 = vstv %s1654_s16  ;;  %v769_v49 = vstv %s1676_s12  ;;  %s1024_s2 = sld [smem:[#allocation15 + $0x1]] }
 0x112   :  { %s1025_s4 = sld [smem:[#allocation15 + $0x2]] }
 0x113   :  { %s2070_s23 = sld [smem:[#allocation46_spill]] }
 0x115   :  { %v781_v58 = vstv %s2047_s17 }
 0x119   :  { %s928_s24 = sshll.u32 %s2070_s23, 4  ;;  %s929_s24 = int_to_ptr.hbm [resolvable:$true] %s928_s24 }
 0x129   :  { %v556_v7 = vpop.permute.xlu2 %555 }
 0x131   :  { %v620_v28 = vpop.permute.xlu2 %619 }
 0x141   :  { %v558_v20 = vpop.permute.xlu0 %557 }
 0x142   :  { %v560_v22 = vsel %vm559_vm12, %v556_v7, %v558_v20  ;;  %v561_v41 = vsel %vm559_vm12, %v558_v20, %v556_v7 }
 0x143   :  { %v562_v51 = vsel %vm1379_vm1, %v560_v22, 0.0  ;;  %v563_v23 = vsel %vm1415_vm9, %v561_v41, 0.0 }
 0x144   :  { %v566_v43 = vmul.f32 %v565_v63, %v562_v51  ;;  %v567_v25 = vmul.f32 %v565_v63, %v563_v23  ;;  %v572_v34 = vmul.f32 %v571_v45, %v562_v51  ;;  %v573_v37 = vmul.f32 %v571_v45, %v563_v23 }
 0x145   :  { %v578_v61 = vmul.f32 %v577_v1, %v562_v51  ;;  %v579_v7 = vmul.f32 %v577_v1, %v563_v23  ;;  %v584_v20 = vmul.f32 %v583_v55, %v562_v51  ;;  %v585_v41 = vmul.f32 %v583_v55, %v563_v23 }
 0x146   :  { %v568_v15 = vadd.f32 %v566_v43, %v1693_v26  ;;  %v569_v63 = vadd.f32 %v567_v25, %v1665_v9  ;;  %v590_v17 = vmul.f32 %v589_v0, %v562_v51  ;;  %v861_v45 = vstv %s1749_s30 }
 0x147   :  { %v574_v3 = vadd.f32 %v572_v34, %v1696_v29  ;;  %v575_v1 = vadd.f32 %v573_v37, %v1668_v46  ;;  %v591_v22 = vmul.f32 %v589_v0, %v563_v23  ;;  %v596_v55 = vmul.f32 %v595_v54, %v562_v51 }
 0x148   :  { %v580_v47 = vadd.f32 %v578_v61, %v1699_v13  ;;  %v581_v26 = vadd.f32 %v579_v7, %v1671_v60  ;;  %v586_v9 = vadd.f32 %v584_v20, %v1702_v57  ;;  %v597_v43 = vmul.f32 %v595_v54, %v563_v23 }
 0x149   :  { %v618_v24 = vpop.permute.xlu1 %617  ;;  %v587_v46 = vadd.f32 %v585_v41, %v1674_v33  ;;  %v602_v29 = vmul.f32 %v601_v39, %v562_v51  ;;  %v603_v13 = vmul.f32 %v601_v39, %v563_v23  ;;  %v608_v60 = vmul.f32 %v607_v31, %v562_v51 }
 0x14a   :  { %v592_v11 = vadd.f32 %v590_v17, %v1707_v38  ;;  %v609_v57 = vmul.f32 %v607_v31, %v563_v23  ;;  %v622_v0 = vsel %vm621_vm14, %v618_v24, %v620_v28  ;;  %v623_v33 = vsel %vm621_vm14, %v620_v28, %v618_v24 }
 0x14b   :  { %v593_v54 = vadd.f32 %v591_v22, %v1679_v8  ;;  %v598_v39 = vadd.f32 %v596_v55, %v1710_v6  ;;  %v624_v51 = vsel %vm1387_vm4, %v622_v0, 0.0  ;;  %v625_v25 = vsel %vm226_vm15, %v623_v33, 0.0 }
 0x14c   :  { %v599_v38 = vadd.f32 %v597_v43, %v1682_v4  ;;  %v628_v31 = vmul.f32 %v627_v5, %v624_v51  ;;  %v629_v23 = vmul.f32 %v627_v5, %v625_v25  ;;  %v634_v28 = vmul.f32 %v633_v27, %v624_v51 }
 0x14d   :  { %v604_v8 = vadd.f32 %v602_v29, %v1713_v59  ;;  %v635_v6 = vmul.f32 %v633_v27, %v625_v25  ;;  %v640_v14 = vmul.f32 %v639_v19, %v624_v51  ;;  %v641_v24 = vmul.f32 %v639_v19, %v625_v25 }
 0x14e   :  { %v605_v4 = vadd.f32 %v603_v13, %v1685_v52  ;;  %v610_v17 = vadd.f32 %v608_v60, %v1716_v48  ;;  %v646_v34 = vmul.f32 %v645_v62, %v624_v51  ;;  %v647_v5 = vmul.f32 %v645_v62, %v625_v25 }
 0x14f   :  { %v611_v37 = vadd.f32 %v609_v57, %v1688_v21  ;;  %v630_v61 = vadd.f32 %v628_v31, %v568_v15  ;;  %v631_v59 = vadd.f32 %v629_v23, %v569_v63  ;;  %v636_v27 = vadd.f32 %v634_v28, %v574_v3 }
 0x150   :  { %v652_v7 = vmul.f32 %v651_v36, %v624_v51  ;;  %v653_v19 = vmul.f32 %v651_v36, %v625_v25  ;;  %v658_v52 = vmul.f32 %v657_v40, %v624_v51  ;;  %v659_v48 = vmul.f32 %v657_v40, %v625_v25 }
 0x151   :  { %v680_v20 = vpop.permute.xlu0 %679  ;;  %v637_v22 = vadd.f32 %v635_v6, %v575_v1  ;;  %v642_v41 = vadd.f32 %v640_v14, %v580_v47  ;;  %v643_v62 = vadd.f32 %v641_v24, %v581_v26  ;;  %v664_v21 = vmul.f32 %v663_v32, %v624_v51  ;;  %v682_v15 = vpop.permute.xlu1 %681 }
 0x152   :  { %v648_v63 = vadd.f32 %v646_v34, %v586_v9  ;;  %v649_v3 = vadd.f32 %v647_v5, %v587_v46  ;;  %v665_v55 = vmul.f32 %v663_v32, %v625_v25  ;;  %v670_v36 = vmul.f32 %v669_v44, %v624_v51  ;;  %v742_v34 = vpop.permute.xlu2 %741 }
 0x153   :  { %v654_v40 = vadd.f32 %v652_v7, %v592_v11  ;;  %v655_v1 = vadd.f32 %v653_v19, %v593_v54  ;;  %v660_v47 = vadd.f32 %v658_v52, %v598_v39  ;;  %v671_v26 = vmul.f32 %v669_v44, %v625_v25 }
 0x154   :  { %v661_v43 = vadd.f32 %v659_v48, %v599_v38  ;;  %v666_v9 = vadd.f32 %v664_v21, %v604_v8  ;;  %v684_v46 = vsel %vm683_vm0, %v680_v20, %v682_v15  ;;  %v685_v32 = vsel %vm683_vm0, %v682_v15, %v680_v20 }
 0x155   :  { %v687_v29 = vsel %vm216_vm13, %v685_v32, 0.0  ;;  %v690_v13 = vmul.f32 %v689_v18, %v684_v46  ;;  %v696_v60 = vmul.f32 %v695_v2, %v684_v46  ;;  %v702_v44 = vmul.f32 %v701_v30, %v684_v46 }
 0x156   :  { %v667_v11 = vadd.f32 %v665_v55, %v605_v4  ;;  %v672_v57 = vadd.f32 %v670_v36, %v610_v17  ;;  %v691_v0 = vmul.f32 %v689_v18, %v687_v29  ;;  %v697_v33 = vmul.f32 %v695_v2, %v687_v29 }
 0x157   :  { %v673_v54 = vadd.f32 %v671_v26, %v611_v37  ;;  %v703_v39 = vmul.f32 %v701_v30, %v687_v29  ;;  %v708_v51 = vmul.f32 %v707_v12, %v684_v46  ;;  %v709_v25 = vmul.f32 %v707_v12, %v687_v29 }
 0x158   :  { %v692_v38 = vadd.f32 %v690_v13, %v630_v61  ;;  %v693_v31 = vadd.f32 %v691_v0, %v631_v59  ;;  %v698_v23 = vadd.f32 %v696_v60, %v636_v27  ;;  %v704_v28 = vadd.f32 %v702_v44, %v642_v41 }
 0x159   :  { %v699_v8 = vadd.f32 %v697_v33, %v637_v22  ;;  %v714_v6 = vmul.f32 %v713_v42, %v684_v46  ;;  %v715_v18 = vmul.f32 %v713_v42, %v687_v29  ;;  %v720_v2 = vmul.f32 %v719_v10, %v684_v46  ;;  %v744_v17 = vpop.permute.xlu0 %743 }
 0x15a   :  { %v721_v14 = vmul.f32 %v719_v10, %v687_v29  ;;  %v726_v30 = vmul.f32 %v725_v56, %v684_v46  ;;  %v727_v24 = vmul.f32 %v725_v56, %v687_v29  ;;  %v2050_v4 = vstv %s1656_s11 }
 0x15b   :  { %v732_v12 = vmul.f32 %v2050_v4, %v684_v46  ;;  %v705_v5 = vadd.f32 %v703_v39, %v643_v62  ;;  %v710_v37 = vadd.f32 %v708_v51, %v648_v63  ;;  %v711_v61 = vadd.f32 %v709_v25, %v649_v3 }
 0x15c   :  { %v2051_v59 = vmov %v2050_v4  ;;  %v716_v42 = vadd.f32 %v714_v6, %v654_v40  ;;  %v717_v10 = vadd.f32 %v715_v18, %v655_v1  ;;  %v722_v56 = vadd.f32 %v720_v2, %v660_v47 }
 0x15d   :  { %v733_v27 = vmul.f32 %v2051_v59, %v687_v29  ;;  %v723_v7 = vadd.f32 %v721_v14, %v661_v43  ;;  %v728_v19 = vadd.f32 %v726_v30, %v666_v9  ;;  %v729_v52 = vadd.f32 %v727_v24, %v667_v11 }
 0x15e   :  { %v746_v48 = vsel %vm745_vm2, %v742_v34, %v744_v17  ;;  %v747_v35 = vsel %vm745_vm2, %v744_v17, %v742_v34  ;;  %v734_v50 = vadd.f32 %v732_v12, %v672_v57  ;;  %v2052_v62 = vstv %s1658_s0 }
 0x15f   :  { %v735_v20 = vadd.f32 %v733_v27, %v673_v54  ;;  %v748_v22 = vsel %vm1379_vm1, %v746_v48, 0.0  ;;  %v749_v41 = vsel %vm228_vm3, %v747_v35, 0.0  ;;  %v2053_v15 = vmov %v2052_v62 }
 0x160   :  { %v752_v21 = vmul.f32 %v2052_v62, %v748_v22  ;;  %v753_v63 = vmul.f32 %v2053_v15, %v749_v41  ;;  %v2054_v3 = vstv %s1660_s6  ;;  %v2056_v1 = vstv %s1662_s19 }
 0x161   :  { %v758_v55 = vmul.f32 %v2054_v3, %v748_v22  ;;  %v2055_v36 = vmov %v2054_v3  ;;  %v764_v53 = vmul.f32 %v2056_v1, %v748_v22  ;;  %v2057_v47 = vmov %v2056_v1 }
 0x162   :  { %v759_v40 = vmul.f32 %v2055_v36, %v749_v41  ;;  %v765_v26 = vmul.f32 %v2057_v47, %v749_v41  ;;  %v770_v16 = vmul.f32 %v769_v49, %v748_v22  ;;  %v771_v43 = vmul.f32 %v769_v49, %v749_v41 }
 0x163   :  { %v754_v9 = vadd.f32 %v752_v21, %v692_v38  ;;  %v755_v46 = vadd.f32 %v753_v63, %v693_v31  ;;  %v760_v32 = vadd.f32 %v758_v55, %v698_v23  ;;  %v766_v13 = vadd.f32 %v764_v53, %v704_v28 }
 0x164   :  { %v761_v29 = vadd.f32 %v759_v40, %v699_v8  ;;  %v767_v60 = vadd.f32 %v765_v26, %v705_v5  ;;  %v772_v44 = vadd.f32 %v770_v16, %v710_v37  ;;  %v773_v11 = vadd.f32 %v771_v43, %v711_v61 }
 0x165   :  { %v2058_v57 = vstv %s2046_s1  ;;  %v782_v39 = vmul.f32 %v781_v58, %v748_v22  ;;  %v783_v51 = vmul.f32 %v781_v58, %v749_v41  ;;  %v2060_v25 = vstv %s1718_s15 }
 0x166   :  { %v776_v0 = vmul.f32 %v2058_v57, %v748_v22  ;;  %v2059_v33 = vmov %v2058_v57  ;;  %v788_v6 = vmul.f32 %v2060_v25, %v748_v22  ;;  %v2061_v49 = vmov %v2060_v25 }
 0x167   :  { %v777_v54 = vmul.f32 %v2059_v33, %v749_v41  ;;  %v789_v18 = vmul.f32 %v2061_v49, %v749_v41  ;;  %v2062_v38 = vstv %s1724_s14  ;;  %v784_v14 = vadd.f32 %v782_v39, %v722_v56 }
 0x168   :  { %v794_v31 = vmul.f32 %v2062_v38, %v748_v22  ;;  %v2063_v23 = vmov %v2062_v38  ;;  %v778_v28 = vadd.f32 %v776_v0, %v716_v42  ;;  %v785_v30 = vadd.f32 %v783_v51, %v723_v7 }
 0x169   :  { %v795_v8 = vmul.f32 %v2063_v23, %v749_v41  ;;  %v779_v2 = vadd.f32 %v777_v54, %v717_v10  ;;  %v790_v24 = vadd.f32 %v788_v6, %v728_v19  ;;  %v791_v4 = vadd.f32 %v789_v18, %v729_v52 }
 0x16a   :  { %v796_v12 = vadd.f32 %v794_v31, %v734_v50  ;;  %v800_v34 = vrot.slane %v778_v28, 2  ;;  %v814_v58 = vrot.slane %v784_v14, 2  ;;  %v815_v37 = vrot.slane %v785_v30, 2 }
 0x16b   :  { %v797_v17 = vadd.f32 %v795_v8, %v735_v20  ;;  %v801_v5 = vrot.slane %v779_v2, 2  ;;  %v834_v61 = vrot.slane %v790_v24, 2  ;;  %v835_v59 = vrot.slane %v791_v4, 2 }
 0x16c   :  { %v854_v27 = vrot.slane %v796_v12, 2  ;;  %v804_v10 = vadd.f32 %v800_v34, %v754_v9  ;;  %v818_v7 = vadd.f32 %v814_v58, %v760_v32  ;;  %v819_v19 = vadd.f32 %v815_v37, %v761_v29 }
 0x16d   :  { %v855_v42 = vrot.slane %v797_v17, 2  ;;  %v805_v56 = vadd.f32 %v801_v5, %v755_v46  ;;  %v838_v52 = vadd.f32 %v834_v61, %v766_v13  ;;  %v839_v48 = vadd.f32 %v835_v59, %v767_v60 }
 0x16e   :  { %v858_v35 = vadd.f32 %v854_v27, %v772_v44  ;;  %v2064_v20 = vstv %s1730_s13  ;;  %v2066_v21 = vstv %s1736_s28  ;;  %v2068_v55 = vstv %s1743_s29  ;;  %v1053_v27 = vld [vmem:[#allocation16] sm:$0xff] }
 0x16f   :  { %v859_v50 = vadd.f32 %v855_v42, %v773_v11  ;;  %v808_v22 = vadd.f32 %v2064_v20, %v804_v10  ;;  %v2065_v41 = vmov %v2064_v20  ;;  %v822_v15 = vadd.f32 %v2066_v21, %v818_v7  ;;  %v1054_v10 = vld [vmem:[#allocation16 + $0x8] sm:$0xff] }
 0x170   :  { %v809_v62 = vadd.f32 %v2065_v41, %v805_v56  ;;  %v2067_v63 = vmov %v2066_v21  ;;  %v842_v36 = vadd.f32 %v2068_v55, %v838_v52  ;;  %v2069_v40 = vmov %v2068_v55 }
 0x171   :  { %v823_v3 = vadd.f32 %v2067_v63, %v819_v19  ;;  %v843_v1 = vadd.f32 %v2069_v40, %v839_v48  ;;  %v862_v53 = vadd.f32 %v861_v45, %v858_v35  ;;  %v863_v47 = vadd.f32 %v861_v45, %v859_v50  ;;  %810 = vst [vmem:[#allocation3] sm:$0x3] %v808_v22 }
 0x172   :  { %v826_v26 = vrot.slane %v822_v15, 6  ;;  %811 = vst [vmem:[#allocation3 + $0x8] sm:$0x3] %v809_v62  ;;  %v846_v43 = vrot.slane %v842_v36, 4  ;;  %vm888_vm1 = vcmask 1024   ;;  %v1189_v29 = vmov 0.0  }
 0x173   :  { %v827_v16 = vrot.slane %v823_v3, 6  ;;  %v847_v9 = vrot.slane %v843_v1, 4  ;;  %v866_v46 = vrot.slane %v862_v53, 2  ;;  %v867_v32 = vrot.slane %v863_v47, 2  ;;  %889 = vst.msk [vmem:[#allocation4] sm:$0x3] %vm888_vm1, %v1189_v29 }
 0x174   :  { %830 = vst [vmem:[#allocation3] sm:$0xc] %v826_v26  ;;  %v1190_v49 = vmov 0   ;;  %vm890_vm4 = vcmask 7168   ;;  %v896_v31 = vstv %s895_s18  ;;  %v899_v23 = vstv %s1024_s2 }
 0x175   :  { %831 = vst [vmem:[#allocation3 + $0x8] sm:$0xc] %v827_v16  ;;  %1043 = vset.pattern.permute.xlu2 %v1190_v49  ;;  %1044 = vset.pattern.permute.xlu0 %v1190_v49  ;;  %v903_v8 = vstv %s1025_s4 }
 0x176   :  { %850 = vst [vmem:[#allocation3] sm:$0x30] %v846_v43 }
 0x177   :  { %851 = vst [vmem:[#allocation3 + $0x8] sm:$0x30] %v847_v9 }
 0x178   :  { %870 = vst [vmem:[#allocation3] sm:$0xc0] %v866_v46 }
 0x179   :  { %871 = vst [vmem:[#allocation3 + $0x8] sm:$0xc0] %v867_v32 }
 0x17a   :  { %892 = vst.msk [vmem:[#allocation4 + $0xa] sm:$0x3] %vm888_vm1, %v1189_v29 }
 0x17f   :  { %v872_v13 = vld [vmem:[#allocation3] sm:$0xff] }
 0x180   :  { %v873_v45 = vld [vmem:[#allocation3 + $0x8] sm:$0xff]  ;;  %v874_v60 = vmul.f32 0.5, %v872_v13 }
 0x181   :  { %v875_v44 = vmul.f32 0.5, %v873_v45 }
 0x182   :  { %1047 = vtanh.f32 %v874_v60 }
 0x183   :  { %1049 = vtanh.f32 %v875_v44 }
 0x188   :  { %v1048_v11 = vpop.eup %1047 }
 0x189   :  { %v1050_v57 = vpop.eup %1049  ;;  %v878_v0 = vadd.f32 1.0, %v1048_v11 }
 0x18a   :  { %v879_v33 = vadd.f32 1.0, %v1050_v57 }
 0x18b   :  { %v880_v54 = vmul.f32 0.5, %v878_v0 }
 0x18c   :  { %v881_v39 = vmul.f32 0.5, %v879_v33 }
 0x18d   :  { %v882_v51 = vmul.f32 %v880_v54, %v872_v13 }
 0x18e   :  { %v883_v25 = vmul.f32 %v881_v39, %v873_v45 }
 0x190   :  { %v884_v6 = vadd.f32 %v883_v25, %v882_v51 }
 0x192   :  { %885 = vadd.xlane.f32.xlu1 %v884_v6 }
 0x205   :  { %v886_v18 = vpop.xlane.xlu1 %885 }
 0x206   :  { %v887_v38 = vmul.f32 0.00390625, %v886_v18 }
 0x208   :  { %891 = vst.msk [vmem:[#allocation4 + $0x2] sm:$0xff] %vm890_vm4, %v887_v38  ;;  %v900_v30 = vmul.f32 %v899_v23, %v887_v38 }
 0x20f   :  { %v893_v28 = vld [vmem:[#allocation4] sm:$0xff] }
 0x210   :  { %v894_v2 = vld [vmem:[#allocation4 + $0x4] sm:$0xff]  ;;  %v897_v14 = vmul.f32 %v896_v31, %v893_v28 }
 0x211   :  { %v904_v4 = vmul.f32 %v903_v8, %v894_v2 }
 0x212   :  { %v901_v24 = vadd.f32 %v900_v30, %v897_v14 }
 0x214   :  { %v905_v12 = vadd.f32 %v904_v4, %v901_v24 }
 0x216   :  { %v906_v17 = vmul.f32 0.5, %v905_v12 }
 0x218   :  { %1051 = vtanh.f32 %v906_v17 }
 0x21e   :  { %v1052_v34 = vpop.eup %1051 }
 0x21f   :  { %v908_v5 = vadd.f32 1.0, %v1052_v34 }
 0x221   :  { %v909_v58 = vmul.f32 0.5, %v908_v5 }
 0x223   :  { %912 = vperm.xlu2 %1043, %v909_v58  }
 0x27d   :  { %v913_v37 = vpop.permute.xlu2 %912 }
 0x27e   :  { %v915_v61 = vmul.f32 %v913_v37, %v882_v51  ;;  %v916_v59 = vmul.f32 %v913_v37, %v883_v25 }
 0x280   :  { %v917_v42 = vadd.f32 %v1053_v27, %v915_v61  ;;  %v918_v56 = vadd.f32 %v1054_v10, %v916_v59 }
 0x282   :  { %919 = vst [vmem:[#allocation17] sm:$0xff] %v917_v42 }
 0x283   :  { %920 = vst [vmem:[#allocation17 + $0x8] sm:$0xff] %v918_v56 }
 0x284   :  { %931 = dma.vmem_to_hbm [thread:$0]  %s927_s20, 256, %s929_s24, [#allocation7]  }
 0x285   :  { %1173 = dma.done.wait [#allocation7], 256  }
 0x286   :  { %1174 = vsyncadd [#allocation7], 4294967040 }
 0x287   :  { %936 = vsyncpa [#allocation6], 1 }
 0x288   :  { %937 = vsyncpa [#allocation7], 1 }
 0x289   :  { %938 = vsyncpa [#allocation8], 1 }
 0x28a   :  { %939 = vsyncpa [#allocation11], 1 }
 0x28b   :  { %940 = vsyncpa [#allocation9], 1 }
 0x28c   :  { %941 = vsyncpa [#allocation14], 1 }

</bundles_post_ra>
